<compile_context>
chip_gen: v7x
topology: tpu7x:2x2x1
jax: 0.10.0
libtpu: 0.0.40
codegen_flags: <defaults>
</compile_context>

<pallas_src>
import functools

import jax
import jax.numpy as jnp
from jax import lax
from jax.experimental import pallas as pl
from jax.experimental.pallas import tpu as pltpu

LMDA = 0.005  # default hyperparameter from the paper / module __init__


def _vmem_limit_bytes() -> int:
    """Per-generation scoped-VMEM limit (v7x: 64 MiB physical; v5e/v6e: 128 MiB)."""
    try:
        kind = jax.devices()[0].device_kind.lower()
    except Exception:
        kind = ""
    if "v7" in kind:
        return 48 * 1024 * 1024
    return 80 * 1024 * 1024


def _make_vpu_kernel(K: int, D: int, pad_cols: int):
    """2K <= 8: per-view static lane slices + unrolled unique-pair dots (VPU/XLU)."""
    two_k = 2 * K

    def kernel(online_ref, momentum_ref, c_ref, gram_ref):
        tb = online_ref.shape[0]
        # Static lane slices of the flat (tb, K*D) tiles -> no sublane relayout.
        views = [online_ref[:, k * D:(k + 1) * D].astype(jnp.float32)
                 for k in range(K)]
        views += [momentum_ref[:, k * D:(k + 1) * D].astype(jnp.float32)
                  for k in range(K)]

        # Centroid: mean over the 2K views, accumulated in f32.
        acc = views[0]
        for v in views[1:]:
            acc = acc + v
        c_ref[...] = (acc * (1.0 / two_k)).astype(c_ref.dtype)

        # Unique pairwise inner products (symmetry -> ~half the reduce work).
        dots = {}
        for a in range(two_k):
            for b in range(a, two_k):
                d_ab = jnp.sum(views[a] * views[b], axis=-1, keepdims=True)  # (tb, 1)
                dots[(a, b)] = d_ab
                dots[(b, a)] = d_ab
        cols = [dots[(a, b)] for a in range(two_k) for b in range(two_k)]
        n_pad = pad_cols - two_k * two_k
        if n_pad > 0:
            cols.append(jnp.zeros((tb, n_pad), dtype=jnp.float32))
        # Single lane-dense (tb, pad_cols) store (pad_cols is a multiple of 128).
        gram_ref[...] = jnp.concatenate(cols, axis=-1)

    return kernel


def _make_mxu_kernel(K: int, pad_cols: int):
    """2K > 8: one stacked (tb, 2K, D) tile + a single batched einsum on the MXU."""
    two_k = 2 * K

    def kernel(online_ref, momentum_ref, c_ref, gram_ref):
        z = jnp.concatenate([online_ref[...], momentum_ref[...]], axis=1)  # (tb,2K,D)
        tb = z.shape[0]
        g = jnp.einsum("bkd,bld->bkl", z, z,
                       preferred_element_type=jnp.float32)                # (tb,2K,2K)
        c = jnp.mean(z.astype(jnp.float32), axis=1)                       # (tb, D)
        c_ref[...] = c.astype(c_ref.dtype)
        g_flat = g.reshape(tb, two_k * two_k)
        n_pad = pad_cols - two_k * two_k
        if n_pad > 0:
            g_flat = jnp.concatenate(
                [g_flat, jnp.zeros((tb, n_pad), dtype=jnp.float32)], axis=-1)
        gram_ref[...] = g_flat

    return kernel


def _choose_batch_tile(B: int, per_sample_bytes: int, budget_bytes: int) -> int:
    """Largest multiple-of-8 batch tile that fits the VMEM budget while keeping
    the grid >= 2 steps (>= 4 for large B) for pipelining / v7x megacore."""
    tb_vmem = max(8, (budget_bytes // max(per_sample_bytes, 1)) // 8 * 8)
    if B >= 4 * 256:     # 4+ steps while keeping >= 256-row blocks (HBM roofline)
        steps = 4
    elif B >= 16:        # always at least 2 pipeline steps when possible
        steps = 2
    else:
        steps = 1
    tb_cap = max(8, (B // steps) // 8 * 8)
    return max(8, min(tb_vmem, tb_cap))


@functools.partial(jax.jit, static_argnames=("lmda",))
def mmcr_loss(online: jax.Array, momentum: jax.Array, lmda: float = LMDA) -> jax.Array:
    assert online.shape == momentum.shape, "online and momentum need the same shape"
    B, K, D = online.shape
    two_k = 2 * K
    pad_cols = int(pl.cdiv(two_k * two_k, 128)) * 128
    in_dtype = online.dtype
    in_itemsize = jnp.dtype(in_dtype).itemsize
    c_itemsize = in_itemsize  # centroid emitted in the input dtype

    use_vpu = two_k <= 8  # beyond that the unrolled pair loop spills; use the MXU
    vmem_limit = _vmem_limit_bytes()
    budget = int(vmem_limit * 0.70)

    # Per-sample VMEM footprint: double-buffered inputs, f32 working set,
    # per-pair dot columns (~one sublane-row of a vreg per sample each) and
    # double-buffered outputs.
    n_pairs = two_k * (two_k + 1) // 2
    inputs_b = 2 * (K * D * in_itemsize) * 2
    if use_vpu:
        work_b = two_k * D * 4 + n_pairs * 512 + pad_cols * 4
    else:
        k_pad = -(-two_k // 8) * 8  # sublane-padded stacked z
        work_b = k_pad * D * 4 + two_k * two_k * 4 + pad_cols * 4
    outputs_b = (D * c_itemsize + pad_cols * 4) * 2
    per_sample = inputs_b + work_b + outputs_b

    tb = _choose_batch_tile(B, per_sample, budget)

    # Pad the batch to a multiple of the tile (zero samples contribute zero
    # singular values and are sliced back off below).
    b_pad = int(pl.cdiv(B, tb)) * tb
    if b_pad != B:
        pad = [(0, b_pad - B), (0, 0), (0, 0)]
        online_p = jnp.pad(online, pad)
        momentum_p = jnp.pad(momentum, pad)
    else:
        online_p, momentum_p = online, momentum
    grid = (b_pad // tb,)

    if use_vpu:
        kernel = _make_vpu_kernel(K, D, pad_cols)
        # Free metadata reshape: fold the view axis into lanes (no sublane padding).
        a_in = online_p.reshape(b_pad, K * D)
        b_in = momentum_p.reshape(b_pad, K * D)
        in_specs = [pl.BlockSpec((tb, K * D), lambda i: (i, 0)),
                    pl.BlockSpec((tb, K * D), lambda i: (i, 0))]
    else:
        kernel = _make_mxu_kernel(K, pad_cols)
        a_in, b_in = online_p, momentum_p
        in_specs = [pl.BlockSpec((tb, K, D), lambda i: (i, 0, 0)),
                    pl.BlockSpec((tb, K, D), lambda i: (i, 0, 0))]

    cost = pl.CostEstimate(
        flops=b_pad * n_pairs * D * 2 + b_pad * two_k * D,
        transcendentals=0,
        bytes_accessed=2 * b_pad * K * D * in_itemsize
        + b_pad * D * c_itemsize + b_pad * pad_cols * 4,
    )

    c_out, gram_flat = pl.pallas_call(
        kernel,
        out_shape=(
            jax.ShapeDtypeStruct((b_pad, D), in_dtype),            # centroid c
            jax.ShapeDtypeStruct((b_pad, pad_cols), jnp.float32),  # flattened gram_z
        ),
        grid_spec=pltpu.PrefetchScalarGridSpec(
            num_scalar_prefetch=0,
            grid=grid,
            in_specs=in_specs,
            out_specs=[
                pl.BlockSpec((tb, D), lambda i: (i, 0)),
                pl.BlockSpec((tb, pad_cols), lambda i: (i, 0)),
            ],
        ),
        compiler_params=pltpu.CompilerParams(
            dimension_semantics=("parallel",),
            vmem_limit_bytes=vmem_limit,
        ),
        cost_estimate=cost,
    )(a_in, b_in)

    c = c_out[:B].astype(jnp.float32)
    gram_z = gram_flat[:B, : two_k * two_k].reshape(B, two_k, two_k)

    # TODO(synk): torch.linalg.svd (iterative eigensolver) has no clean Pallas
    # equivalent; singular values are recovered from the kernel-computed Gram
    # matrices with jnp.linalg.eigvalsh in plain JAX.
    S_z = jnp.sqrt(jnp.clip(jnp.linalg.eigvalsh(gram_z), 0.0, None))  # (B, 2K)

    # Centroid Gram on the smaller side (nonzero eigenvalues are identical).
    if B <= D:
        gram_c = lax.dot_general(c, c, (((1,), (1,)), ((), ())),
                                 preferred_element_type=jnp.float32)  # (B, B)
    else:
        gram_c = lax.dot_general(c, c, (((0,), (0,)), ((), ())),
                                 preferred_element_type=jnp.float32)  # (D, D)
    S_c = jnp.sqrt(jnp.clip(jnp.linalg.eigvalsh(gram_c), 0.0, None))

    return -1.0 * jnp.sum(S_c) + lmda * jnp.sum(S_z) / B


def _reference_loss(online, momentum, lmda=LMDA):
    """Pure-JAX reference mirroring the PyTorch module verbatim."""
    B = online.shape[0]
    z = jnp.concatenate([online, momentum], axis=1)
    c = jnp.mean(z, axis=1)
    S_z = jnp.linalg.svd(z, compute_uv=False)
    S_c = jnp.linalg.svd(c, compute_uv=False)
    return -1.0 * jnp.sum(S_c) + lmda * jnp.sum(S_z) / B


if __name__ == "__main__":
    B, K, D = 8, 2, 32  # batch, views per branch, embedding dim

    key = jax.random.PRNGKey(0)
    k_on, k_mo = jax.random.split(key)
    online = jax.random.normal(k_on, (B, K, D), dtype=jnp.float32)
    momentum = jax.random.normal(k_mo, (B, K, D), dtype=jnp.float32)

    loss = jax.block_until_ready(mmcr_loss(online, momentum))
    ref = jax.block_until_ready(_reference_loss(online, momentum))

    assert jnp.isfinite(loss), "loss is not finite"
    assert jnp.allclose(loss, ref, rtol=1e-2, atol=1e-2), (loss, ref)

    print("KERNEL_OK")
</pallas_src>

<mosaic_0001>
module attributes {stable_mosaic.version = 11 : i64} {
  func.func @kernel(%arg0: i32, %arg1: memref<8x64xf32, #tpu.memory_space<vmem>>, %arg2: memref<8x64xf32, #tpu.memory_space<vmem>>, %arg3: memref<8x32xf32, #tpu.memory_space<vmem>>, %arg4: memref<8x128xf32, #tpu.memory_space<vmem>>) attributes {dimension_semantics = [#tpu.dimension_semantics<parallel>], iteration_bounds = array<i64: 1>, scalar_prefetch = 0 : i64, scratch_operands = 0 : i64, tpu.core_type = #tpu.core_type<tc>, window_params = [{transform_indices = @transform_0, window_bounds = array<i64: 8, 64>}, {transform_indices = @transform_1, window_bounds = array<i64: 8, 64>}, {transform_indices = @transform_2, window_bounds = array<i64: 8, 32>}, {transform_indices = @transform_3, window_bounds = array<i64: 8, 128>}]} {
    %c0 = arith.constant 0 : index
    %c0_0 = arith.constant 0 : index
    %0 = vector.load %arg1[%c0, %c0_0] : memref<8x64xf32, #tpu.memory_space<vmem>>, vector<8x32xf32>
    %c0_1 = arith.constant 0 : index
    %c32 = arith.constant 32 : index
    %1 = vector.load %arg1[%c0_1, %c32] : memref<8x64xf32, #tpu.memory_space<vmem>>, vector<8x32xf32>
    %c0_2 = arith.constant 0 : index
    %c0_3 = arith.constant 0 : index
    %2 = vector.load %arg2[%c0_2, %c0_3] : memref<8x64xf32, #tpu.memory_space<vmem>>, vector<8x32xf32>
    %c0_4 = arith.constant 0 : index
    %c32_5 = arith.constant 32 : index
    %3 = vector.load %arg2[%c0_4, %c32_5] : memref<8x64xf32, #tpu.memory_space<vmem>>, vector<8x32xf32>
    %4 = arith.addf %0, %1 : vector<8x32xf32>
    %5 = arith.addf %4, %2 : vector<8x32xf32>
    %6 = arith.addf %5, %3 : vector<8x32xf32>
    %cst = arith.constant 2.500000e-01 : f32
    %7 = vector.broadcast %cst : f32 to vector<8x32xf32>
    %8 = arith.mulf %6, %7 : vector<8x32xf32>
    %c0_6 = arith.constant 0 : index
    %c0_7 = arith.constant 0 : index
    %9 = vector.load %arg3[%c0_6, %c0_7] : memref<8x32xf32, #tpu.memory_space<vmem>>, vector<8x32xf32>
    tpu.vector_store %arg3[%c0_6, %c0_7], %8 {strides = array<i32>} : memref<8x32xf32, #tpu.memory_space<vmem>>, vector<8x32xf32>,
    %10 = arith.mulf %0, %0 : vector<8x32xf32>
    %cst_8 = arith.constant dense<0.000000e+00> : vector<8xf32>
    %11 = vector.multi_reduction <add>, %10, %cst_8 [1] : vector<8x32xf32> to vector<8xf32>
    %12 = vector.shape_cast %11 : vector<8xf32> to vector<8x1xf32>
    %13 = arith.mulf %0, %1 : vector<8x32xf32>
    %cst_9 = arith.constant dense<0.000000e+00> : vector<8xf32>
    %14 = vector.multi_reduction <add>, %13, %cst_9 [1] : vector<8x32xf32> to vector<8xf32>
    %15 = vector.shape_cast %14 : vector<8xf32> to vector<8x1xf32>
    %16 = arith.mulf %0, %2 : vector<8x32xf32>
    %cst_10 = arith.constant dense<0.000000e+00> : vector<8xf32>
    %17 = vector.multi_reduction <add>, %16, %cst_10 [1] : vector<8x32xf32> to vector<8xf32>
    %18 = vector.shape_cast %17 : vector<8xf32> to vector<8x1xf32>
    %19 = arith.mulf %0, %3 : vector<8x32xf32>
    %cst_11 = arith.constant dense<0.000000e+00> : vector<8xf32>
    %20 = vector.multi_reduction <add>, %19, %cst_11 [1] : vector<8x32xf32> to vector<8xf32>
    %21 = vector.shape_cast %20 : vector<8xf32> to vector<8x1xf32>
    %22 = arith.mulf %1, %1 : vector<8x32xf32>
    %cst_12 = arith.constant dense<0.000000e+00> : vector<8xf32>
    %23 = vector.multi_reduction <add>, %22, %cst_12 [1] : vector<8x32xf32> to vector<8xf32>
    %24 = vector.shape_cast %23 : vector<8xf32> to vector<8x1xf32>
    %25 = arith.mulf %1, %2 : vector<8x32xf32>
    %cst_13 = arith.constant dense<0.000000e+00> : vector<8xf32>
    %26 = vector.multi_reduction <add>, %25, %cst_13 [1] : vector<8x32xf32> to vector<8xf32>
    %27 = vector.shape_cast %26 : vector<8xf32> to vector<8x1xf32>
    %28 = arith.mulf %1, %3 : vector<8x32xf32>
    %cst_14 = arith.constant dense<0.000000e+00> : vector<8xf32>
    %29 = vector.multi_reduction <add>, %28, %cst_14 [1] : vector<8x32xf32> to vector<8xf32>
    %30 = vector.shape_cast %29 : vector<8xf32> to vector<8x1xf32>
    %31 = arith.mulf %2, %2 : vector<8x32xf32>
    %cst_15 = arith.constant dense<0.000000e+00> : vector<8xf32>
    %32 = vector.multi_reduction <add>, %31, %cst_15 [1] : vector<8x32xf32> to vector<8xf32>
    %33 = vector.shape_cast %32 : vector<8xf32> to vector<8x1xf32>
    %34 = arith.mulf %2, %3 : vector<8x32xf32>
    %cst_16 = arith.constant dense<0.000000e+00> : vector<8xf32>
    %35 = vector.multi_reduction <add>, %34, %cst_16 [1] : vector<8x32xf32> to vector<8xf32>
    %36 = vector.shape_cast %35 : vector<8xf32> to vector<8x1xf32>
    %37 = arith.mulf %3, %3 : vector<8x32xf32>
    %cst_17 = arith.constant dense<0.000000e+00> : vector<8xf32>
    %38 = vector.multi_reduction <add>, %37, %cst_17 [1] : vector<8x32xf32> to vector<8xf32>
    %39 = vector.shape_cast %38 : vector<8xf32> to vector<8x1xf32>
    %cst_18 = arith.constant 0.000000e+00 : f32
    %40 = vector.broadcast %cst_18 : f32 to vector<8x112xf32>
    %41 = tpu.concatenate %12, %15, %18, %21, %15, %24, %27, %30, %18, %27, %33, %36, %21, %30, %36, %39 in 1 : vector<8x1xf32>, vector<8x1xf32>, vector<8x1xf32>, vector<8x1xf32>, vector<8x1xf32>, vector<8x1xf32>, vector<8x1xf32>, vector<8x1xf32>, vector<8x1xf32>, vector<8x1xf32>, vector<8x1xf32>, vector<8x1xf32>, vector<8x1xf32>, vector<8x1xf32>, vector<8x1xf32>, vector<8x1xf32> -> vector<8x16xf32>
    %42 = tpu.concatenate %41, %40 in 1 : vector<8x16xf32>, vector<8x112xf32> -> vector<8x128xf32>
    %c0_19 = arith.constant 0 : index
    %c0_20 = arith.constant 0 : index
    %43 = vector.load %arg4[%c0_19, %c0_20] : memref<8x128xf32, #tpu.memory_space<vmem>>, vector<8x128xf32>
    tpu.vector_store %arg4[%c0_19, %c0_20], %42 {strides = array<i32>} : memref<8x128xf32, #tpu.memory_space<vmem>>, vector<8x128xf32>,
    return
  }
  func.func @transform_0(%arg0: i32) -> (i32, i32) {
    %c0_i32 = arith.constant 0 : i32
    %c0_i32_0 = arith.constant 0 : i32
    return %arg0, %c0_i32 : i32, i32
  }
  func.func @transform_1(%arg0: i32) -> (i32, i32) {
    %c0_i32 = arith.constant 0 : i32
    %c0_i32_0 = arith.constant 0 : i32
    return %arg0, %c0_i32 : i32, i32
  }
  func.func @transform_2(%arg0: i32) -> (i32, i32) {
    %c0_i32 = arith.constant 0 : i32
    %c0_i32_0 = arith.constant 0 : i32
    return %arg0, %c0_i32 : i32, i32
  }
  func.func @transform_3(%arg0: i32) -> (i32, i32) {
    %c0_i32 = arith.constant 0 : i32
    %c0_i32_0 = arith.constant 0 : i32
    return %arg0, %c0_i32 : i32, i32
  }
}

</mosaic_0001>

<bundles_post_ra>
// kernel: custom-call.6
= control target key start
LH: loop header
LB: loop body
LE: loop exit
PB: predicated region body
PF: predicated region fallthrough
CT: control target
= control target key end

     0   :  { %11 = vsyncpa [#allocation14], 0  ;;  %s1851_s0 = inlined_call_operand.vmem [shape: f32[4,4], index: 0, kind: input, shape index: {}]   ;;  %s1852_s1 = inlined_call_operand.vmem [shape: f32[4,4], index: 1, kind: input, shape index: {}]   ;;  %s1853_s2 = inlined_call_operand.vmem [shape: f32[4,4], index: 2, kind: input, shape index: {}]   ;;  %s1854_s3 = inlined_call_operand.vmem [shape: f32[4,4], index: 3, kind: input, shape index: {}]   ;;  %s1855_s4 = inlined_call_operand.vmem [shape: f32[4], index: 4, kind: output, shape index: {0}]   ;;  %s1856_s5 = inlined_call_operand.vmem [shape: f32[4], index: 5, kind: output, shape index: {1}]   ;;  %s1857_s6 = inlined_call_operand.hbm [shape: f32[4,4], index: 6, kind: output, shape index: {2}]   ;;  %s1858_s7 = inlined_call_operand.hbm [shape: f32[4,4], index: 7, kind: output, shape index: {3}]   ;;  %s1859_s8 = inlined_call_operand.hbm [shape: f32[4,4], index: 8, kind: output, shape index: {4}]   ;;  %s1860_s9 = inlined_call_operand.hbm [shape: f32[4,4], index: 9, kind: output, shape index: {5}]  }
   0x1   :  { %12 = vsyncpa [#allocation17], 0 }
   0x2   :  { %13 = vsyncpa [#allocation22], 0  ;;  %v74_v0 = vld [vmem:[%s1851_s0] sm:$0xf]  ;;  %v295_v2 = vlaneseq  ;;  %v1527_v7 = vmov 0.0   ;;  %s294_s0 = smov [#allocation12] }
   0x3   :  { %v136_v1 = vld [vmem:[%s1852_s1] sm:$0xf]  ;;  %75 = vst [vmem:[#allocation1] sm:$0xf] %v74_v0  ;;  %290 = vst [vmem:[#allocation12] sm:$0xff] %v1527_v7  ;;  %s307_s1 = smov [#allocation20] }
   0x4   :  { %137 = vst [vmem:[#allocation3] sm:$0xf] %v136_v1  ;;  %v198_v3 = vld [vmem:[%s1853_s2] sm:$0xf]  ;;  %v1596_v5 = vand.u32 127, %v295_v2  ;;  %v1598_v6 = vshrl.u32 %v295_v2, 7 }
   0x5   :  { %v260_v4 = vld [vmem:[%s1854_s3] sm:$0xf]  ;;  %199 = vst [vmem:[#allocation5] sm:$0xf] %v198_v3  ;;  %291 = vst [vmem:[#allocation15] sm:$0xff] %v1527_v7  ;;  %s278_s2 = smov [#allocation23] }
   0x6   :  { %261 = vst [vmem:[#allocation7] sm:$0xf] %v260_v4  ;;  %292 = vst [vmem:[#allocation18] sm:$0xff] %v1527_v7  ;;  %v297_v5 = vmov %v1596_v5  ;;  %v300_v6 = vmov %v1598_v6  ;;  %s281_s3 = smov [#allocation24]  ;;  %s284_s17 = smov [#allocation25]  ;;  %vm1223_vm2 = vcmp.lt.s32.totalorder %v1596_v5, 4 }
   0x7   :  { %293 = vst [vmem:[#allocation20] sm:$0xff] %v1527_v7  ;;  %v310_v5 = vmov %v1596_v5  ;;  %v313_v6 = vmov %v1598_v6  ;;  %vm304_vm0 = vcmp.eq.s32.totalorder %v300_v6, %v297_v5  ;;  %s287_s18 = smov [#allocation26]  ;;  %s1219_s19 = smov [#allocation23] }
   0x8   :  { %vm317_vm1 = vcmp.eq.s32.totalorder %v313_v6, %v310_v5  ;;  %s1236_s20 = smov [#allocation24]  ;;  %v1215_v5 = vmov %v1596_v5  ;;  %v1218_v6 = vmov %v1598_v6  ;;  %s1253_s21 = smov [#allocation25] }
   0x9   :  { %s1270_s22 = smov [#allocation26]  ;;  %vm1228_vm3 = vcmp.eq.s32.totalorder %v1218_v6, %v1215_v5  ;;  %v1266_v5 = vmov %v1596_v5  ;;  %v1235_v6 = vmov %v1598_v6 }
   0xa   :  { %v264_v8 = vld [vmem:[#allocation1] sm:$0xf]  ;;  %v301_v12 = vld [vmem:[%s294_s0] sm:$0xf]  ;;  %v1232_v5 = vmov %v1596_v5  ;;  %v1269_v6 = vmov %v1598_v6 }
   0xb   :  { %v268_v9 = vld [vmem:[#allocation3] sm:$0xf]  ;;  %265 = vst [vmem:[#allocation0] sm:$0xf] %v264_v8  ;;  %v305_v14 = vsel %vm304_vm0, 1.0, %v301_v12  ;;  %v1249_v5 = vmov %v1596_v5  ;;  %v1252_v6 = vmov %v1598_v6  ;;  %vm1279_vm4 = vcmp.eq.s32.totalorder %v1269_v6, %v1266_v5 }
   0xc   :  { %269 = vst [vmem:[#allocation2] sm:$0xf] %v268_v9  ;;  %v272_v10 = vld [vmem:[#allocation5] sm:$0xf]  ;;  %306 = vst [vmem:[%s294_s0] sm:$0xf] %v305_v14 }
   0xd   :  { %v276_v11 = vld [vmem:[#allocation7] sm:$0xf]  ;;  %273 = vst [vmem:[#allocation4] sm:$0xf] %v272_v10 }
   0xe   :  { %277 = vst [vmem:[#allocation6] sm:$0xf] %v276_v11  ;;  %v314_v13 = vld [vmem:[%s307_s1] sm:$0xf] }
   0xf   :  { %v318_v15 = vsel %vm317_vm1, 1.0, %v314_v13 }
  0x10   :  { %319 = vst [vmem:[%s307_s1] sm:$0xf] %v318_v15 }
  0x12   :  { %v279_v16 = vld [vmem:[#allocation0] sm:$0xff] }
  0x13   :  { %v282_v17 = vld [vmem:[#allocation2] sm:$0xff]  ;;  %280 = vst [vmem:[%s278_s2] sm:$0xff] %v279_v16 }
  0x14   :  { %283 = vst [vmem:[%s281_s3] sm:$0xff] %v282_v17  ;;  %v285_v18 = vld [vmem:[#allocation4] sm:$0xff] }
  0x15   :  { %v288_v19 = vld [vmem:[#allocation6] sm:$0xff]  ;;  %286 = vst [vmem:[%s284_s17] sm:$0xff] %v285_v18 }
  0x16   :  { %289 = vst [vmem:[%s287_s18] sm:$0xff] %v288_v19 }
  0x1a   :  { %v1225_v20 = vld [vmem:[%s1219_s19] sm:$0xf] }
  0x1b   :  { %v1242_v21 = vld [vmem:[%s1236_s20] sm:$0xf]  ;;  %v1226_v22 = vsel %vm1223_vm2, %v1225_v20, 0.0 }
  0x1c   :  { %v1243_v23 = vsel %vm1223_vm2, %v1242_v21, 0.0  ;;  %v1259_v24 = vld [vmem:[%s1253_s21] sm:$0xf]  ;;  %v1227_v26 = vmul.f32 %v1226_v22, %v1226_v22 }
  0x1d   :  { %v1276_v25 = vld [vmem:[%s1270_s22] sm:$0xf]  ;;  %v1244_v27 = vmul.f32 %v1243_v23, %v1243_v23  ;;  %v1260_v28 = vsel %vm1223_vm2, %v1259_v24, 0.0 }
  0x1e   :  { %v1277_v29 = vsel %vm1223_vm2, %v1276_v25, 0.0  ;;  %v1261_v30 = vmul.f32 %v1260_v28, %v1260_v28  ;;  %v1229_v33 = vsel %vm1228_vm3, 0.0, %v1227_v26 }
  0x1f   :  { %v1246_v31 = vadd.f32 %v1244_v27, %v1227_v26  ;;  %v1278_v32 = vmul.f32 %v1277_v29, %v1277_v29  ;;  %v1245_v34 = vadd.f32 %v1244_v27, %v1229_v33 }
  0x21   :  { %v1263_v35 = vadd.f32 %v1261_v30, %v1246_v31  ;;  %v1262_v36 = vadd.f32 %v1261_v30, %v1245_v34  ;;  %v1280_v37 = vsel %vm1279_vm4, 0.0, %v1278_v32 }
  0x23   :  { %v1282_v38 = vadd.f32 %v1278_v32, %v1263_v35  ;;  %v1281_v39 = vadd.f32 %v1280_v37, %v1262_v36 }
  0x25   :  { %1283 = vadd.xlane.f32.xlu0 %v1282_v38 }
  0x29   :  { %1291 = vadd.xlane.f32.xlu0 %v1281_v39 }
  0xb2   :  { %v1284_v40 = vpop.xlane.xlu0 %1283 }
  0xb3   :  { %v1285_v41 = vrot.slane %v1284_v40, 4 }
  0xb5   :  { %v1286_v42 = vadd.f32 %v1285_v41, %v1284_v40 }
  0xb6   :  { %v1292_v43 = vpop.xlane.xlu0 %1291 }
  0xb7   :  { %v1287_v44 = vrot.slane %v1286_v42, 2  ;;  %v1293_v45 = vrot.slane %v1292_v43, 4 }
  0xb9   :  { %v1294_v46 = vadd.f32 %v1293_v45, %v1292_v43  ;;  %v1288_v47 = vadd.f32 %v1287_v44, %v1286_v42 }
  0xbb   :  { %v1295_v48 = vrot.slane %v1294_v46, 2  ;;  %v1289_v50 = vrot.slane %v1288_v47, 1 }
  0xbd   :  { %v1296_v49 = vadd.f32 %v1295_v48, %v1294_v46  ;;  %v1290_v53 = vadd.f32 %v1289_v50, %v1288_v47 }
  0xbf   :  { %v1297_v51 = vrot.slane %v1296_v49, 1 }
  0xc1   :  { %v1298_v52 = vadd.f32 %v1297_v51, %v1296_v49 }
  0xc3   :  { %1378 = vpush %v1298_v52 }
  0xc4   :  { %1380 = vpush %v1290_v53 }
  0xf4   :  { %s1379_s23 = spop %1378 }
  0xf5   :  { %s1381_s24 = spop %1380 }
  0xf6   :  { %s1301_s25 = smul.f32 1e-10, %s1381_s24 }
  0xf8   :  { %p1302_p0 = scmp.le.f32.partialorder %s1379_s23, %s1301_s25 }
  0xf9   :  { %s1622_s26 = smov (!%p1302_p0), 0  }
  0xfa   :  { %1305 = sbr.rel (%p1302_p0) target bundleno = 932 (0x3a4), region = 324 }
 0x101 LB: > { %s1627_s27 = smov 0   ;;  %s1521_s26 = sphi %s1622_s26, %s1861_s26  }
 0x102 LB: >> { %s424_s28 = smov [#allocation23]  ;;  %v428_v5 = vmov %v1596_v5  ;;  %v431_v6 = vmov %v1598_v6  ;;  %s444_s29 = smov [#allocation24]  ;;  %vm747_vm14 = vcmp.eq.s32.totalorder %v1598_v6, 0  ;;  %vm759_vm15 = vcmp.eq.s32.totalorder %v1598_v6, 3  ;;  %s1525_s27 = sphi %s1627_s27, %s423_s27  }
 0x103   : >> { %v448_v5 = vmov %v1596_v5  ;;  %v451_v6 = vmov %v1598_v6  ;;  %v432_v54 = vld [vmem:[%s424_s28] sm:$0xf]  ;;  %vm435_vm5 = vcmp.eq.s32.totalorder %v431_v6, %v428_v5  ;;  %s464_s30 = smov [#allocation26]  ;;  %s425_s10 = smov [#allocation27] }
 0x104   : >> { %vm455_vm6 = vcmp.eq.s32.totalorder %v451_v6, %v448_v5  ;;  %v468_v5 = vmov %v1596_v5  ;;  %v471_v6 = vmov %v1598_v6  ;;  %v436_v55 = vsel %vm435_vm5, %v432_v54, 0.0  ;;  %v452_v56 = vld [vmem:[%s444_s29] sm:$0xf]  ;;  %s445_s11 = smov [#allocation28]  ;;  %s465_s12 = smov [#allocation29] }
 0x105   : >> { %vm475_vm7 = vcmp.eq.s32.totalorder %v471_v6, %v468_v5  ;;  %v437_v57 = vrot.slane %v436_v55, 4  ;;  %v456_v58 = vsel %vm455_vm6, %v452_v56, 0.0  ;;  %v472_v59 = vld [vmem:[%s464_s30] sm:$0xf]  ;;  %s488_s13 = smov [#allocation28]  ;;  %s486_s14 = smov [#allocation27]  ;;  %v537_v5 = vmov %v1596_v5 }
 0x106   : >> { %v457_v60 = vrot.slane %v456_v58, 4  ;;  %v476_v61 = vsel %vm475_vm7, %v472_v59, 0.0  ;;  %s490_s15 = smov [#allocation29]  ;;  %s525_s16 = smov [#allocation30]  ;;  %v540_v6 = vmov %v1598_v6  ;;  %v552_v5 = vmov %v1596_v5 }
 0x107   : >> { %v438_v62 = vadd.f32 %v437_v57, %v436_v55  ;;  %v477_v63 = vrot.slane %v476_v61, 4  ;;  %s527_s0 = smov [#allocation31]  ;;  %s484_s1 = smov [#allocation32]  ;;  %v555_v6 = vmov %v1598_v6  ;;  %vm542_vm12 = vcmp.eq.s32.totalorder %v540_v6, %v537_v5 }
 0x108   : >> { %v458_v0 = vadd.f32 %v457_v60, %v456_v58  ;;  %s485_s2 = smov [#allocation33]  ;;  %s529_s1 = smov %s484_s1  ;;  %vm557_vm13 = vcmp.eq.s32.totalorder %v555_v6, %v552_v5  ;;  %v650_v5 = vmov %v1596_v5  ;;  %v653_v6 = vmov %v1598_v6 }
 0x109   : >> { %v439_v1 = vrot.slane %v438_v62, 2  ;;  %v478_v2 = vadd.f32 %v477_v63, %v476_v61  ;;  %s531_s2 = smov %s485_s2  ;;  %s533_s3 = smov [#allocation32]  ;;  %v664_v5 = vmov %v1596_v5  ;;  %v667_v6 = vmov %v1598_v6 }
 0x10a   : >> { %v459_v3 = vrot.slane %v458_v0, 2  ;;  %s548_s17 = smov [#allocation33]  ;;  %s546_s18 = smov [#allocation34]  ;;  %vm657_vm0 = vcmp.eq.s32.totalorder %v653_v6, %v650_v5  ;;  %v623_v5 = vmov %v1596_v5  ;;  %v626_v6 = vmov %v1598_v6 }
 0x10b   : >> { %v440_v4 = vadd.f32 %v439_v1, %v438_v62  ;;  %v479_v7 = vrot.slane %v478_v2, 2  ;;  %s563_s19 = smov [#allocation34]  ;;  %s1642_s20 = smov [#allocation23]  ;;  %v637_v5 = vmov %v1596_v5  ;;  %v640_v6 = vmov %v1598_v6 }
 0x10c   : >> { %v460_v8 = vadd.f32 %v459_v3, %v458_v0  ;;  %s561_s21 = smov [#allocation35]  ;;  %s1644_s22 = smov [#allocation24]  ;;  %v571_v53 = vld [vmem:[%s1642_s20] sm:$0xf]  ;;  %vm672_vm1 = vcmp.eq.s32.totalorder %v667_v6, %v664_v5  ;;  %vm631_vm3 = vcmp.eq.s32.totalorder %v626_v6, %v623_v5  ;;  %vm644_vm4 = vcmp.eq.s32.totalorder %v640_v6, %v637_v5 }
 0x10d   : >> { %v441_v9 = vrot.slane %v440_v4, 1  ;;  %v480_v10 = vadd.f32 %v479_v7, %v478_v2  ;;  %s1646_s23 = smov [#allocation25]  ;;  %s1648_s24 = smov [#allocation26]  ;;  %v572_v54 = vld [vmem:[%s1644_s22] sm:$0xf]  ;;  %vm686_vm5 = vcmp.eq.s32.totalorder %v1596_v5, 0 }
 0x10e   : >> { %v461_v11 = vrot.slane %v460_v8, 1  ;;  %s1650_s25 = smov [#allocation12]  ;;  %s1652_s28 = smov [#allocation15]  ;;  %v573_v55 = vld [vmem:[%s1646_s23] sm:$0xf]  ;;  %vm690_vm6 = vcmp.eq.s32.totalorder %v1596_v5, 1 }
 0x10f   : >> { %v442_v12 = vadd.f32 %v441_v9, %v440_v4  ;;  %v481_v13 = vrot.slane %v480_v10, 1  ;;  %s1654_s29 = smov [#allocation18]  ;;  %s787_s30 = smov [#allocation34]  ;;  %v574_v56 = vld [vmem:[%s1648_s24] sm:$0xf]  ;;  %vm703_vm7 = vcmp.eq.s32.totalorder %v1596_v5, 3 }
 0x110   : >> { %v462_v14 = vadd.f32 %v461_v11, %v460_v8  ;;  %v795_v57 = vld [vmem:[%s1650_s25] sm:$0xf]  ;;  %s423_s27 = sadd.s32 1, %s1525_s27  }
 0x111   : >> { %443 = vst [vmem:[%s425_s10] sm:$0x1] %v442_v12  ;;  %v482_v15 = vadd.f32 %v481_v13, %v480_v10  ;;  %s1658_s10 = smov [#allocation20]  ;;  %v796_v58 = vld [vmem:[%s1652_s28] sm:$0xf]  ;;  %p420_p1 = scmp.ge.s32.totalorder %s423_s27, 7  }
 0x112   : >> { %463 = vst [vmem:[%s445_s11] sm:$0x1] %v462_v14  ;;  %v797_v59 = vld [vmem:[%s1654_s29] sm:$0xf]  ;;  %s565_s11 = smov [#allocation35]  ;;  %v324_v5 = vmov (%p420_p1), %v1596_v5  ;;  %v327_v6 = vmov (%p420_p1), %v1598_v6 }
 0x113   : >> { %483 = vst [vmem:[%s465_s12] sm:$0x1] %v482_v15  ;;  %v798_v61 = vld [vmem:[%s1658_s10] sm:$0xf]  ;;  %s789_s12 = smov [#allocation35]  ;;  %v377_v5 = vmov (%p420_p1), %v1596_v5 }
 0x118   : >> { %v487_v18 = vld [vmem:[%s486_s14] sm:$0xff]  ;;  %s593_s14 = smov [#allocation33] }
 0x119   : >> { %v489_v16 = vld [vmem:[%s488_s13] sm:$0xff]  ;;  %v510_v31 = vand.u32 2147483647, %v487_v18  ;;  %s591_s13 = smov [#allocation32] }
 0x11a   : >> { %v493_v17 = vmul.f32 2.0, %v489_v16  ;;  %v491_v19 = vld [vmem:[%s490_s15] sm:$0xff]  ;;  %v511_v36 = vand.u32 2147483647, %v489_v16  ;;  %s1674_s15 = smov [#allocation12] }
 0x11b   : >> { %v492_v20 = vsub.f32 %v491_v19, %v487_v18  ;;  %v512_v32 = vand.u32 2147483647, %v491_v19 }
 0x11c   : >> { %1409 = vrcp.f32 %v493_v17 }
 0x11d   : >> { %v513_v35 = vmin.f32 %v510_v31, %v512_v32 }
 0x11f   : >> { %v514_v37 = vmul.f32 1.1920929e-08, %v513_v35 }
 0x121   : >> { %vm515_vm11 = vcmp.le.f32.partialorder %v511_v36, %v514_v37 }
 0x126   : >> { %v1410_v21 = vpop.eup %1409 }
 0x127   : >> { %v495_v22 = vmul.f32 %v1410_v21, %v492_v20 }
 0x129   : >> { %v497_v23 = vmul.f32 %v495_v22, %v495_v22  ;;  %vm496_vm10 = vcmp.ge.f32.partialorder %v495_v22, 0.0 }
 0x12b   : >> { %v498_v24 = vadd.f32 1.0, %v497_v23 }
 0x12d   : >> { %1411 = vrsqrt.f32 %v498_v24  ;;  %vm501_vm8 = vcmp.eq.f32.partialorder %v498_v24, inf  ;;  %v504_v26 = vand.u32 2147483648, %v498_v24  ;;  %vm503_vm9 = vcmp.eq.f32.partialorder %v498_v24, 0.0 }
 0x137   : >> { %v1412_v25 = vpop.eup %1411 }
 0x138   : >> { %v500_v27 = vmul.f32 %v1412_v25, %v498_v24 }
 0x13a   : >> { %v502_v28 = vsel %vm501_vm8, %v498_v24, %v500_v27  ;;  %vm339_vm8 = vcmp.eq.s32.totalorder (%p420_p1), %v327_v6, %v324_v5  ;;  %v380_v6 = vmov (%p420_p1), %v1598_v6  ;;  %v343_v5 = vmov (%p420_p1), %v1596_v5 }
 0x13b   : >> { %v505_v29 = vsel %vm503_vm9, %v504_v26, %v502_v28  ;;  %v346_v6 = vmov (%p420_p1), %v1598_v6  ;;  %v360_v5 = vmov (%p420_p1), %v1596_v5  ;;  %vm392_vm9 = vcmp.eq.s32.totalorder (%p420_p1), %v380_v6, %v377_v5 }
 0x13c   : >> { %v506_v30 = vxor.u32 2147483648, %v505_v29  ;;  %v363_v6 = vmov (%p420_p1), %v1598_v6 }
 0x13e   : >> { %v507_v33 = vsel %vm496_vm10, %v505_v29, %v506_v30 }
 0x13f   : >> { %v508_v34 = vadd.f32 %v507_v33, %v495_v22 }
 0x141   : >> { %1413 = vrcp.f32 %v508_v34 }
 0x14b   : >> { %v1414_v38 = vpop.eup %1413 }
 0x14c   : >> { %v516_v39 = vsel %vm515_vm11, 0.0, %v1414_v38 }
 0x14d   : >> { %v517_v40 = vmul.f32 %v516_v39, %v516_v39  ;;  %v521_v41 = vmul.f32 %v516_v39, %v489_v16 }
 0x14f   : >> { %v518_v42 = vadd.f32 1.0, %v517_v40  ;;  %v522_v43 = vsub.f32 %v487_v18, %v521_v41  ;;  %v524_v44 = vadd.f32 %v521_v41, %v491_v19 }
 0x151   : >> { %1415 = vrsqrt.f32 %v518_v42  ;;  %526 = vst [vmem:[%s525_s16] sm:$0xff] %v522_v43  ;;  %528 = vst [vmem:[%s527_s0] sm:$0xff] %v524_v44  ;;  %s1676_s16 = smov [#allocation25]  ;;  %s1678_s0 = smov [#allocation26] }
 0x15b   : >> { %v1416_v45 = vpop.eup %1415 }
 0x15c   : >> { %530 = vst [vmem:[%s529_s1] sm:$0xff] %v1416_v45  ;;  %v520_v46 = vmul.f32 %v1416_v45, %v516_v39  ;;  %s1680_s1 = smov [#allocation23] }
 0x15e   : >> { %532 = vst [vmem:[%s531_s2] sm:$0xff] %v520_v46  ;;  %s1682_s2 = smov [#allocation18] }
 0x163   : >> { %v534_v47 = vld [vmem:[%s533_s3] ss:$0 sm:$0xff]  ;;  %s1684_s3 = smov [#allocation15] }
 0x164   : >> { %v543_v48 = vsel %vm542_vm12, %v534_v47, 0.0  ;;  %v592_v27 = vld [vmem:[%s591_s13] ss:$0 sm:$0xff]  ;;  %s763_s13 = smov [#allocation24] }
 0x165   : >> { %544 = vadd.xlane.f32.xlu0 %v543_v48  ;;  %v549_v49 = vld [vmem:[%s548_s17] ss:$0 sm:$0xff]  ;;  %s1688_s17 = smov [#allocation20] }
 0x166   : >> { %v558_v50 = vsel %vm557_vm13, %v549_v49, 0.0  ;;  %v594_v28 = vld [vmem:[%s593_s14] ss:$0 sm:$0xff]  ;;  %s740_s14 = smov [#allocation25] }
 0x169   : >> { %559 = vadd.xlane.f32.xlu0 %v558_v50 }
 0x1f2   : >> { %v545_v51 = vpop.xlane.xlu0 %544 }
 0x1f3   : >> { %547 = vst [vmem:[%s546_s18] sm:$0xff] %v545_v51  ;;  %s1690_s18 = smov [#allocation24] }
 0x1f6   : >> { %v560_v52 = vpop.xlane.xlu0 %559 }
 0x1f7   : >> { %562 = vst [vmem:[%s561_s21] sm:$0xff] %v560_v52  ;;  %s660_s21 = smov [#allocation26] }
 0x1fa   : >> { %v564_v60 = vld [vmem:[%s563_s19] sm:$0xff]  ;;  %s661_s19 = smov [#allocation31] }
 0x1fb   : >> { %v788_v62 = vld [vmem:[%s787_s30] sm:$0xff]  ;;  %v575_v63 = vmul.f32 %v571_v53, %v564_v60  ;;  %v578_v0 = vmul.f32 %v572_v54, %v564_v60  ;;  %v582_v1 = vmul.f32 %v573_v55, %v564_v60  ;;  %v585_v2 = vmul.f32 %v574_v56, %v564_v60  ;;  %s676_s30 = smov [#allocation24] }
 0x1fc   : >> { %v799_v3 = vmul.f32 %v795_v57, %v788_v62  ;;  %v802_v4 = vmul.f32 %v796_v58, %v788_v62  ;;  %v806_v7 = vmul.f32 %v797_v59, %v788_v62  ;;  %v809_v8 = vmul.f32 %v798_v61, %v788_v62 }
 0x1fe   : >> { %v566_v9 = vld [vmem:[%s565_s11] sm:$0xff]  ;;  %s1735_s11 = smov [#allocation26] }
 0x1ff   : >> { %v790_v10 = vld [vmem:[%s789_s12] sm:$0xff]  ;;  %v576_v11 = vmul.f32 %v573_v55, %v566_v9  ;;  %v579_v12 = vmul.f32 %v574_v56, %v566_v9  ;;  %v581_v13 = vmul.f32 %v571_v53, %v566_v9  ;;  %v584_v14 = vmul.f32 %v572_v54, %v566_v9  ;;  %s739_s12 = smov [#allocation23] }
 0x200   : >> { %v800_v15 = vmul.f32 %v797_v59, %v790_v10  ;;  %v803_v16 = vmul.f32 %v798_v61, %v790_v10  ;;  %v805_v17 = vmul.f32 %v795_v57, %v790_v10  ;;  %v808_v18 = vmul.f32 %v796_v58, %v790_v10  ;;  %v668_v59 = vld [vmem:[%s661_s19] ss:$0 sm:$0xff] }
 0x201   : >> { %v577_v19 = vsub.f32 %v575_v63, %v576_v11  ;;  %v580_v20 = vsub.f32 %v578_v0, %v579_v12  ;;  %v583_v21 = vadd.f32 %v582_v1, %v581_v13  ;;  %v586_v22 = vadd.f32 %v585_v2, %v584_v14 }
 0x202   : >> { %v801_v23 = vsub.f32 %v799_v3, %v800_v15  ;;  %v804_v24 = vsub.f32 %v802_v4, %v803_v16  ;;  %v807_v25 = vadd.f32 %v806_v7, %v805_v17  ;;  %v810_v26 = vadd.f32 %v809_v8, %v808_v18 }
 0x203   : >> { %588 = vst [vmem:[%s1644_s22] sm:$0xf] %v580_v20  ;;  %590 = vst [vmem:[%s1648_s24] sm:$0xf] %v586_v22  ;;  %s620_s22 = smov [#allocation30]  ;;  %s634_s24 = smov [#allocation24] }
 0x204   : >> { %587 = vst [vmem:[%s1642_s20] sm:$0xf] %v577_v19  ;;  %589 = vst [vmem:[%s1646_s23] sm:$0xf] %v583_v21  ;;  %s647_s20 = smov [#allocation25]  ;;  %s619_s23 = smov [#allocation23]  ;;  %v627_v63 = vld [vmem:[%s620_s22] ss:$0 sm:$0xff] }
 0x205   : >> { %811 = vst [vmem:[%s1650_s25] sm:$0xf] %v801_v23  ;;  %812 = vst [vmem:[%s1652_s28] sm:$0xf] %v804_v24  ;;  %s1732_s25 = smov [#allocation25]  ;;  %s1528_s28 = smov 1  }
 0x206   : >> { %813 = vst [vmem:[%s1654_s29] sm:$0xf] %v807_v25  ;;  %814 = vst [vmem:[%s1658_s10] sm:$0xf] %v810_v26  ;;  %s675_s29 = smov [#allocation23]  ;;  %s1529_s10 = smov 127  }
 0x20a   : >> { %v602_v30 = vld [vmem:[%s1678_s0] sm:$0xf] }
 0x20b   : >> { %v601_v29 = vld [vmem:[%s1676_s16] sm:$0xf]  ;;  %v610_v36 = vmul.f32 %v602_v30, %v594_v28  ;;  %v613_v42 = vmul.f32 %v602_v30, %v592_v27 }
 0x20c   : >> { %v599_v31 = vld [vmem:[%s1680_s1] sm:$0xf]  ;;  %v609_v35 = vmul.f32 %v601_v29, %v592_v27  ;;  %v612_v37 = vmul.f32 %v601_v29, %v594_v28 }
 0x20d   : >> { %v817_v32 = vld [vmem:[%s1674_s15] ss:$0 sm:$0xff]  ;;  %v1365_v34 = vld [vmem:[%s1674_s15 + $0x3] ss:$0 sm:$0xff]  ;;  %v603_v48 = vmul.f32 %v599_v31, %v592_v27  ;;  %v606_v49 = vmul.f32 %v599_v31, %v594_v28 }
 0x20e   : >> { %v1364_v33 = vld [vmem:[%s1674_s15 - $0x1] sm:$0xe]  ;;  %v1369_v45 = vld [vmem:[%s1684_s3 + $0x3] ss:$0 sm:$0xff]  ;;  %v611_v47 = vsub.f32 %v609_v35, %v610_v36  ;;  %v614_v53 = vadd.f32 %v613_v42, %v612_v37 }
 0x20f   : >> { %v824_v38 = vsel %vm747_vm14, %v817_v32, %v1364_v33  ;;  %v828_v39 = vld [vmem:[%s1682_s2] ss:$0 sm:$0xff]  ;;  %v1367_v40 = vld [vmem:[%s1682_s2 + $0x1] sm:$0x7] }
 0x210   : >> { %v841_v41 = vld [vmem:[%s1684_s3] ss:$0 sm:$0xff]  ;;  %827 = vst [vmem:[%s1674_s15] sm:$0xf] %v824_v38  ;;  %v836_v43 = vsel %vm759_vm15, %v1365_v34, %v1367_v40  ;;  %v1371_v51 = vld [vmem:[%s1688_s17 + $0x1] sm:$0x7]  ;;  %617 = vst [vmem:[%s1676_s16] sm:$0xf] %v611_v47 }
 0x211   : >> { %v1368_v44 = vld [vmem:[%s1684_s3 - $0x1] sm:$0xe]  ;;  %1366 = vst [vmem:[%s1674_s15 + $0x1] sm:$0x1] %v828_v39  ;;  %838 = vst [vmem:[%s1682_s2] sm:$0xf] %v836_v43  ;;  %v860_v54 = vsel %vm759_vm15, %v1369_v45, %v1371_v51  ;;  %s764_s15 = smov [#allocation26] }
 0x212   : >> { %v852_v46 = vld [vmem:[%s1688_s17] ss:$0 sm:$0xff]  ;;  %v848_v50 = vsel %vm747_vm14, %v841_v41, %v1368_v44  ;;  %618 = vst [vmem:[%s1678_s0] sm:$0xf] %v614_v53  ;;  %s863_s16 = sadd.s32 (%p420_p1), 1, %s1521_s26   ;;  %s328_s0 = smov (%p420_p1), [#allocation23] }
 0x213   : >> { %v600_v52 = vld [vmem:[%s1690_s18] sm:$0xf]  ;;  %851 = vst [vmem:[%s1684_s3] sm:$0xf] %v848_v50  ;;  %862 = vst [vmem:[%s1688_s17] sm:$0xf] %v860_v54  ;;  %s364_s2 = smov (%p420_p1), [#allocation25]  ;;  %p416_p2 = scmp.ge.s32.totalorder (%p420_p1), %s863_s16, 15 }
 0x214   : >> { %v604_v55 = vmul.f32 %v600_v52, %v594_v28  ;;  %v607_v56 = vmul.f32 %v600_v52, %v592_v27  ;;  %1370 = vst [vmem:[%s1684_s3 + $0x1] sm:$0x1] %v852_v46  ;;  %s381_s3 = smov (%p420_p1), [#allocation26]  ;;  %s1861_s26 = smov (%p420_p1), %s863_s16 }
 0x216   : >> { %v605_v57 = vsub.f32 %v603_v48, %v604_v55  ;;  %v608_v58 = vadd.f32 %v607_v56, %v606_v49 }
 0x217   : >> { %v654_v60 = vld [vmem:[%s647_s20] sm:$0xf] }
 0x218   : >> { %615 = vst [vmem:[%s1680_s1] sm:$0xf] %v605_v57  ;;  %616 = vst [vmem:[%s1690_s18] sm:$0xf] %v608_v58  ;;  %v658_v61 = vsel %vm657_vm0, 0.0, %v654_v60  ;;  %s347_s1 = smov (%p420_p1), [#allocation24] }
 0x219   : >> { %v669_v62 = vld [vmem:[%s660_s21] sm:$0xf]  ;;  %659 = vst [vmem:[%s647_s20] sm:$0xf] %v658_v61 }
 0x21a   : >> { %v673_v0 = vsel %vm672_vm1, %v668_v59, %v669_v62 }
 0x21b   : >> { %674 = vst [vmem:[%s660_s21] sm:$0xf] %v673_v0 }
 0x21f   : >> { %v628_v1 = vld [vmem:[%s619_s23] sm:$0xf] }
 0x220   : >> { %v641_v2 = vld [vmem:[%s634_s24] sm:$0xf]  ;;  %v632_v3 = vsel %vm631_vm3, %v627_v63, %v628_v1 }
 0x221   : >> { %v645_v4 = vsel %vm644_vm4, 0.0, %v641_v2  ;;  %633 = vst [vmem:[%s619_s23] sm:$0xf] %v632_v3  ;;  %v713_v7 = vld [vmem:[%s1732_s25] sm:$0xf] }
 0x222   : >> { %646 = vst [vmem:[%s634_s24] sm:$0xf] %v645_v4  ;;  %714 = vrot.lane.b32.xlu0 %v713_v7, %s1528_s28  ;;  %v709_v11 = vld [vmem:[%s1735_s11] sm:$0xf] }
 0x223   : >> { %v730_v12 = vld [vmem:[%s1735_s11] sm:$0xf] }
 0x224   : >> { %v712_v30 = vld [vmem:[%s1732_s25] sm:$0xf] }
 0x228   : >> { %v681_v8 = vld [vmem:[%s675_s29] sm:$0xf] }
 0x229   : >> { %682 = vrot.lane.b32.xlu1 %v681_v8, %s1528_s28  ;;  %v677_v9 = vld [vmem:[%s676_s30] sm:$0xf] }
 0x22a   : >> { %v698_v10 = vld [vmem:[%s676_s30] sm:$0xf] }
 0x22b   : >> { %v680_v18 = vld [vmem:[%s675_s29] sm:$0xf] }
 0x22d   : >> { %678 = vrot.lane.b32.xlu1 %v677_v9, %s1528_s28 }
 0x231   : >> { %699 = vrot.lane.b32.xlu1 %v698_v10, %s1529_s10 }
 0x235   : >> { %710 = vrot.lane.b32.xlu1 %v709_v11, %s1528_s28 }
 0x239   : >> { %731 = vrot.lane.b32.xlu1 %v730_v12, %s1529_s10 }
 0x294   : >> { %v715_v20 = vpop.permute.xlu0 %714 }
 0x295   : >> { %v719_v22 = vsel %vm686_vm5, %v713_v7, %v715_v20 }
 0x29b   : >> { %v683_v13 = vpop.permute.xlu1 %682 }
 0x29c   : >> { %v687_v14 = vsel %vm686_vm5, %v681_v8, %v683_v13 }
 0x29f   : >> { %v679_v15 = vpop.permute.xlu1 %678 }
 0x2a0   : >> { %v691_v16 = vsel %vm690_vm6, %v679_v15, %v687_v14 }
 0x2a1   : >> { %v697_v17 = vsel %vm1223_vm2, %v691_v16, 0.0 }
 0x2a2   : >> { %705 = vst [vmem:[%s675_s29] sm:$0xf] %v697_v17 }
 0x2a3   : >> { %v700_v19 = vpop.permute.xlu1 %699 }
 0x2a4   : >> { %v704_v21 = vsel %vm703_vm7, %v680_v18, %v700_v19 }
 0x2a5   : >> { %706 = vst [vmem:[%s676_s30] sm:$0xf] %v704_v21 }
 0x2a7   : >> { %v711_v23 = vpop.permute.xlu1 %710 }
 0x2a8   : >> { %v723_v24 = vsel %vm690_vm6, %v711_v23, %v719_v22 }
 0x2a9   : >> { %v741_v25 = vld [vmem:[%s739_s12] ss:$0 sm:$0xff]  ;;  %v1357_v27 = vld [vmem:[%s739_s12 + $0x3] ss:$0 sm:$0xff]  ;;  %v729_v29 = vsel %vm1223_vm2, %v723_v24, 0.0 }
 0x2aa   : >> { %v1356_v26 = vld [vmem:[%s739_s12 - $0x1] sm:$0xe]  ;;  %737 = vst [vmem:[%s1732_s25] sm:$0xf] %v729_v29 }
 0x2ab   : >> { %v748_v28 = vsel %vm747_vm14, %v741_v25, %v1356_v26  ;;  %v732_v31 = vpop.permute.xlu1 %731 }
 0x2ac   : >> { %751 = vst [vmem:[%s739_s12] sm:$0xf] %v748_v28  ;;  %v765_v32 = vld [vmem:[%s763_s13] ss:$0 sm:$0xff]  ;;  %v1361_v34 = vld [vmem:[%s763_s13 + $0x3] ss:$0 sm:$0xff]  ;;  %v736_v35 = vsel %vm703_vm7, %v712_v30, %v732_v31 }
 0x2ad   : >> { %v1360_v33 = vld [vmem:[%s763_s13 - $0x1] sm:$0xe]  ;;  %738 = vst [vmem:[%s1735_s11] sm:$0xf] %v736_v35 }
 0x2ae   : >> { %v772_v36 = vsel %vm747_vm14, %v765_v32, %v1360_v33 }
 0x2af   : >> { %775 = vst [vmem:[%s763_s13] sm:$0xf] %v772_v36 }
 0x2b1   : >> { %v752_v37 = vld [vmem:[%s740_s14] ss:$0 sm:$0xff]  ;;  %v1359_v38 = vld [vmem:[%s740_s14 + $0x1] sm:$0x7] }
 0x2b2   : >> { %1358 = vst [vmem:[%s739_s12 + $0x1] sm:$0x1] %v752_v37  ;;  %v760_v39 = vsel %vm759_vm15, %v1357_v27, %v1359_v38  ;;  %422 = sbr.rel (!%p420_p1) target bundleno = 258 (0x102), region = 319 }
 0x2b3   : >> { %762 = vst [vmem:[%s740_s14] sm:$0xf] %v760_v39 }
 0x2b4   : >> { %v776_v40 = vld [vmem:[%s764_s15] ss:$0 sm:$0xff]  ;;  %v1363_v41 = vld [vmem:[%s764_s15 + $0x1] sm:$0x7] }
 0x2b5   : >> { %1362 = vst [vmem:[%s763_s13 + $0x1] sm:$0x1] %v776_v40  ;;  %v784_v42 = vsel %vm759_vm15, %v1361_v34, %v1363_v41 }
 0x2b6   : >> { %786 = vst [vmem:[%s764_s15] sm:$0xf] %v784_v42 }
 0x2b9   : > { %v334_v43 = vld [vmem:[%s328_s0] sm:$0xf] }
 0x2ba   : > { %v335_v45 = vsel %vm1223_vm2, %v334_v43, 0.0  ;;  %v370_v47 = vld [vmem:[%s364_s2] sm:$0xf] }
 0x2bb   : > { %v336_v49 = vmul.f32 %v335_v45, %v335_v45  ;;  %v371_v51 = vsel %vm1223_vm2, %v370_v47, 0.0 }
 0x2bc   : > { %v353_v44 = vld [vmem:[%s347_s1] sm:$0xf]  ;;  %v372_v53 = vmul.f32 %v371_v51, %v371_v51 }
 0x2bd   : > { %v354_v46 = vsel %vm1223_vm2, %v353_v44, 0.0  ;;  %v387_v48 = vld [vmem:[%s381_s3] sm:$0xf]  ;;  %v340_v56 = vsel %vm339_vm8, 0.0, %v336_v49 }
 0x2be   : > { %v355_v50 = vmul.f32 %v354_v46, %v354_v46  ;;  %v388_v52 = vsel %vm1223_vm2, %v387_v48, 0.0 }
 0x2bf   : > { %v389_v55 = vmul.f32 %v388_v52, %v388_v52 }
 0x2c0   : > { %v357_v54 = vadd.f32 %v355_v50, %v336_v49  ;;  %v356_v57 = vadd.f32 %v355_v50, %v340_v56 }
 0x2c1   : > { %v393_v60 = vsel %vm392_vm9, 0.0, %v389_v55 }
 0x2c2   : > { %v374_v58 = vadd.f32 %v372_v53, %v357_v54  ;;  %v373_v59 = vadd.f32 %v372_v53, %v356_v57 }
 0x2c4   : > { %v395_v61 = vadd.f32 %v389_v55, %v374_v58  ;;  %v394_v62 = vadd.f32 %v393_v60, %v373_v59 }
 0x2c6   : > { %396 = vadd.xlane.f32.xlu0 %v395_v61 }
 0x2ca   : > { %404 = vadd.xlane.f32.xlu0 %v394_v62 }
 0x353   : > { %v397_v63 = vpop.xlane.xlu0 %396 }
 0x354   : > { %v398_v0 = vrot.slane %v397_v63, 4 }
 0x356   : > { %v399_v1 = vadd.f32 %v398_v0, %v397_v63 }
 0x357   : > { %v405_v2 = vpop.xlane.xlu0 %404 }
 0x358   : > { %v400_v3 = vrot.slane %v399_v1, 2  ;;  %v406_v4 = vrot.slane %v405_v2, 4 }
 0x35a   : > { %v407_v7 = vadd.f32 %v406_v4, %v405_v2  ;;  %v401_v8 = vadd.f32 %v400_v3, %v399_v1 }
 0x35c   : > { %v408_v9 = vrot.slane %v407_v7, 2  ;;  %v402_v11 = vrot.slane %v401_v8, 1 }
 0x35e   : > { %v409_v10 = vadd.f32 %v408_v9, %v407_v7  ;;  %v403_v14 = vadd.f32 %v402_v11, %v401_v8 }
 0x360   : > { %v410_v12 = vrot.slane %v409_v10, 1 }
 0x362   : > { %v411_v13 = vadd.f32 %v410_v12, %v409_v10 }
 0x364   : > { %1382 = vpush %v411_v13 }
 0x365   : > { %1384 = vpush %v403_v14 }
 0x395   : > { %s1383_s27 = spop %1382 }
 0x396   : > { %s1385_s17 = spop %1384 }
 0x397   : > { %s414_s18 = smul.f32 1e-10, %s1385_s17 }
 0x399   : > { %p415_p3 = scmp.le.f32.partialorder %s1383_s27, %s414_s18 }
 0x39b   : > { %p417_p4 = por %p416_p2, %p415_p3 }
 0x39d   :  { %865 = sbr.rel (!%p417_p4) target bundleno = 257 (0x101), region = 330 }
 0x3a4 PF:  { %v927_v15 = vld [vmem:[#allocation15] sm:$0xf]  ;;  %s866_s19 = smov [#allocation23]  ;;  %v870_v5 = vmov %v1596_v5  ;;  %v873_v6 = vmov %v1598_v6  ;;  %v921_v16 = vld [vmem:[#allocation12] sm:$0xf]  ;;  %s1530_s20 = smov [#allocation16]  }
 0x3a5   :  { %v890_v5 = vmov %v1596_v5  ;;  %v893_v6 = vmov %v1598_v6  ;;  %929 = vst [vmem:[#allocation16] sm:$0xf] %v927_v15  ;;  %s1080_s21 = sshll.u32 %s1530_s20, 4  ;;  %v874_v17 = vld [vmem:[%s866_s19] sm:$0xf]  ;;  %vm877_vm10 = vcmp.eq.s32.totalorder %v873_v6, %v870_v5  ;;  %s886_s26 = smov [#allocation26]  ;;  %s1081_s21 = int_to_ptr.vmem [resolvable:$true] %s1080_s21 }
 0x3a6   :  { %vm897_vm11 = vcmp.eq.s32.totalorder %v893_v6, %v890_v5  ;;  %923 = vst [vmem:[#allocation13] sm:$0xf] %v921_v16  ;;  %v933_v18 = vld [vmem:[#allocation18] sm:$0xf]  ;;  %v878_v19 = vsel %vm877_vm10, %v874_v17, 0.0  ;;  %s1417_s22 = scalar_lea.vmem %s1081_s21, 64  ;;  %p1422_p6 = scmp.lt.s32.totalorder %s1081_s21, %s1081_s21 }
 0x3a7   :  { %935 = vst [vmem:[#allocation19] sm:$0xf] %v933_v18  ;;  %v939_v20 = vld [vmem:[#allocation20] sm:$0xf]  ;;  %p1418_p5 = scmp.ne.s32.totalorder %s1081_s21, %s1417_s22  ;;  %p1423_p7 = scmp.lt.s32.totalorder %s1417_s22, %s1417_s22 }
 0x3a9   :  { %p1424_p8 = por %p1423_p7, %p1422_p6 }
 0x3ab   :  { %p1425_p9 = pnand %p1424_p8, %p1418_p5 }
 0x3ad   :  { %1428 = shalt.err (!%p1425_p9)
}
 0x3ae   :  { %s1429_s25 = scalar_lea.hbm %s1858_s7, 64 }
 0x3af   :  { %p1430_p10 = scmp.ne.s32.totalorder %s1858_s7, %s1429_s25  ;;  %p1433_p11 = scmp.lt.u32.totalorder %s1429_s25, %s1858_s7 }
 0x3b1   :  { %p1435_p12 = pnand %p1433_p11, %p1430_p10 }
 0x3b3   :  { %1438 = shalt.err (!%p1435_p12)
}
 0x3b4   :  { %1083 = dma.vmem_to_hbm [thread:$0]  %s1081_s21, 64, %s1858_s7, [#allocation17]   ;;  %v879_v21 = vrot.slane %v878_v19, 4  ;;  %v894_v22 = vld [vmem:[%s886_s26] sm:$0xf] }
 0x3b5   :  { %941 = vst [vmem:[#allocation21] sm:$0xf] %v939_v20  ;;  %v898_v23 = vsel %vm897_vm11, %v894_v22, 0.0  ;;  %s1531_s13 = smov [#allocation13]   ;;  %s1532_s15 = smov [#allocation19]  }
 0x3b6   :  { %v880_v24 = vadd.f32 %v879_v21, %v878_v19  ;;  %v899_v25 = vrot.slane %v898_v23, 4  ;;  %s1073_s14 = sshll.u32 %s1531_s13, 4  ;;  %s1087_s16 = sshll.u32 %s1532_s15, 4  ;;  %s1074_s14 = int_to_ptr.vmem [resolvable:$true] %s1073_s14  ;;  %s1088_s16 = int_to_ptr.vmem [resolvable:$true] %s1087_s16 }
 0x3b7   :  { %s1439_s0 = scalar_lea.vmem %s1074_s14, 64  ;;  %p1444_p0 = scmp.lt.s32.totalorder %s1074_s14, %s1074_s14 }
 0x3b8   :  { %v881_v26 = vrot.slane %v880_v24, 2  ;;  %v900_v27 = vadd.f32 %v899_v25, %v898_v23  ;;  %p1440_p13 = scmp.ne.s32.totalorder %s1074_s14, %s1439_s0  ;;  %p1445_p1 = scmp.lt.s32.totalorder %s1439_s0, %s1439_s0 }
 0x3ba   :  { %p1446_p2 = por %p1445_p1, %p1444_p0 }
 0x3bc   :  { %p1447_p3 = pnand %p1446_p2, %p1440_p13 }
 0x3be   :  { %1450 = shalt.err (!%p1447_p3)
}
 0x3bf   :  { %s1451_s2 = scalar_lea.hbm %s1857_s6, 64 }
 0x3c0   :  { %p1452_p4 = scmp.ne.s32.totalorder %s1857_s6, %s1451_s2  ;;  %p1455_p5 = scmp.lt.u32.totalorder %s1451_s2, %s1857_s6 }
 0x3c2   :  { %p1457_p6 = pnand %p1455_p5, %p1452_p4 }
 0x3c4   :  { %1460 = shalt.err (!%p1457_p6)
}
 0x3c5   :  { %1076 = dma.vmem_to_hbm [thread:$0]  %s1074_s14, 64, %s1857_s6, [#allocation14]   ;;  %v882_v5 = vadd.f32 %v881_v26, %v880_v24  ;;  %v901_v6 = vrot.slane %v900_v27, 2 }
 0x3c6   :  { %s1461_s21 = scalar_lea.vmem %s1088_s16, 64  ;;  %p1466_p8 = scmp.lt.s32.totalorder %s1088_s16, %s1088_s16 }
 0x3c7   :  { %p1462_p7 = scmp.ne.s32.totalorder %s1088_s16, %s1461_s21  ;;  %p1467_p9 = scmp.lt.s32.totalorder %s1461_s21, %s1461_s21 }
 0x3c9   :  { %p1468_p10 = por %p1467_p9, %p1466_p8 }
 0x3cb   :  { %p1469_p11 = pnand %p1468_p10, %p1462_p7 }
 0x3cd   :  { %1472 = shalt.err (!%p1469_p11)
}
 0x3ce   :  { %s1473_s23 = scalar_lea.hbm %s1859_s8, 64 }
 0x3cf   :  { %p1474_p12 = scmp.ne.s32.totalorder %s1859_s8, %s1473_s23  ;;  %p1477_p13 = scmp.lt.u32.totalorder %s1473_s23, %s1859_s8 }
 0x3d1   :  { %p1479_p0 = pnand %p1477_p13, %p1474_p12 }
 0x3d3   :  { %1482 = shalt.err (!%p1479_p0)
}
 0x3d4   :  { %1090 = dma.vmem_to_hbm [thread:$0]  %s1088_s16, 64, %s1859_s8, [#allocation17]   ;;  %v883_v28 = vrot.slane %v882_v5, 1  ;;  %v902_v29 = vadd.f32 %v901_v6, %v900_v27 }
 0x3d5   :  { %s1533_s10 = smov [#allocation21]   ;;  %s867_s12 = smov [#allocation8] }
 0x3d6   :  { %s1094_s11 = sshll.u32 %s1533_s10, 4  ;;  %s1095_s11 = int_to_ptr.vmem [resolvable:$true] %s1094_s11 }
 0x3d7   :  { %s1483_s13 = scalar_lea.vmem %s1095_s11, 64  ;;  %p1488_p2 = scmp.lt.s32.totalorder %s1095_s11, %s1095_s11 }
 0x3d8   :  { %p1484_p1 = scmp.ne.s32.totalorder %s1095_s11, %s1483_s13  ;;  %p1489_p3 = scmp.lt.s32.totalorder %s1483_s13, %s1483_s13 }
 0x3da   :  { %p1490_p4 = por %p1489_p3, %p1488_p2 }
 0x3dc   :  { %p1491_p5 = pnand %p1490_p4, %p1484_p1 }
 0x3de   :  { %1494 = shalt.err (!%p1491_p5)
}
 0x3df   :  { %s1495_s0 = scalar_lea.hbm %s1860_s9, 64 }
 0x3e0   :  { %p1496_p6 = scmp.ne.s32.totalorder %s1860_s9, %s1495_s0  ;;  %p1499_p7 = scmp.lt.u32.totalorder %s1495_s0, %s1860_s9 }
 0x3e2   :  { %p1501_p8 = pnand %p1499_p7, %p1496_p6 }
 0x3e4   :  { %1504 = shalt.err (!%p1501_p8)
}
 0x3e5   :  { %1097 = dma.vmem_to_hbm [thread:$0]  %s1095_s11, 64, %s1860_s9, [#allocation22]   ;;  %v884_v30 = vadd.f32 %v883_v28, %v882_v5  ;;  %v903_v31 = vrot.slane %v902_v29, 1 }
 0x3e6   :  { %s887_s27 = smov [#allocation10] }
 0x3e7   :  { %885 = vst [vmem:[%s867_s12] sm:$0x1] %v884_v30  ;;  %v904_v32 = vadd.f32 %v903_v31, %v902_v29 }
 0x3e9   :  { %905 = vst [vmem:[%s887_s27] sm:$0x1] %v904_v32 }
 0x3ee   :  { %v909_v33 = vld [vmem:[#allocation8] sm:$0x1] }
 0x3ef   :  { %911 = vst [vmem:[#allocation9] sm:$0x1] %v909_v33 }
 0x3f0   :  { %v915_v34 = vld [vmem:[#allocation10] sm:$0x1] }
 0x3f1   :  { %917 = vst [vmem:[#allocation11] sm:$0x1] %v915_v34 }
 0x3f6   :  { %v1004_v35 = vld [vmem:[#allocation9] sm:$0x1] }
 0x3f7   :  { %1005 = vst [vmem:[%s1855_s4] sm:$0x1] %v1004_v35 }
 0x3f8   :  { %v1068_v36 = vld [vmem:[#allocation11] sm:$0x1] }
 0x3f9   :  { %1069 = vst [vmem:[%s1856_s5] sm:$0x1] %v1068_v36 }
 0x3fa   :  { %1513 = dma.done.wait [#allocation14], 64  }
 0x3fb   :  { %1514 = vsyncadd [#allocation14], 4294967232 }
 0x3fc   :  { %1515 = dma.done.wait [#allocation17], 128  }
 0x3fd   :  { %1516 = vsyncadd [#allocation17], 4294967168 }
 0x3fe   :  { %1517 = dma.done.wait [#allocation22], 64  }
 0x3ff   :  { %1518 = vsyncadd [#allocation22], 4294967232 }
 0x400   :  { %1106 = vsyncpa [#allocation14], 1 }
 0x401   :  { %1107 = vsyncpa [#allocation17], 1 }
 0x402   :  { %1108 = vsyncpa [#allocation22], 1 }

// kernel: custom-call.7
= control target key start
LH: loop header
LB: loop body
LE: loop exit
PB: predicated region body
PF: predicated region fallthrough
CT: control target
= control target key end

     0   :  { %s2137_s0 = inlined_call_operand.vmem [shape: f32[8,2,2], index: 0, kind: input, shape index: {}]   ;;  %s2138_s1 = inlined_call_operand.vmem [shape: f32[8,2,2], index: 1, kind: input, shape index: {}]   ;;  %s2139_s2 = inlined_call_operand.vmem [shape: f32[8,2,2], index: 2, kind: input, shape index: {}]   ;;  %s2140_s3 = inlined_call_operand.vmem [shape: f32[8,2,2], index: 3, kind: input, shape index: {}]   ;;  %s2141_s4 = inlined_call_operand.vmem [shape: f32[8,2], index: 4, kind: output, shape index: {0}]   ;;  %s2142_s5 = inlined_call_operand.vmem [shape: f32[8,2], index: 5, kind: output, shape index: {1}]   ;;  %s2143_s6 = inlined_call_operand.hbm [shape: f32[8,2,2], index: 6, kind: output, shape index: {2}]   ;;  %s2144_s7 = inlined_call_operand.hbm [shape: f32[8,2,2], index: 7, kind: output, shape index: {3}]   ;;  %s2145_s8 = inlined_call_operand.hbm [shape: f32[8,2,2], index: 8, kind: output, shape index: {4}]   ;;  %s2146_s9 = inlined_call_operand.hbm [shape: f32[8,2,2], index: 9, kind: output, shape index: {5}]  }
   0x1   :  { %2147 = sst [smem:[#allocation38_spill]] %s2137_s0 }
   0x2   :  { %2148 = sst [smem:[#allocation39_spill]] %s2138_s1 }
   0x3   :  { %11 = vsyncpa [#allocation12], 0 }
   0x4   :  { %13 = vsyncpa [#allocation12 + $0x1], 0 }
   0x5   :  { %14 = vsyncpa [#allocation15], 0 }
   0x6   :  { %16 = vsyncpa [#allocation15 + $0x1], 0 }
   0x7   :  { %17 = vsyncpa [#allocation20], 0 }
   0x8   :  { %19 = vsyncpa [#allocation20 + $0x1], 0  ;;  %s1749_s30 = smov 0   ;;  %s1751_s10 = smov 0  }
   0x9   :  { %s1753_s11 = smov 0  }
   0xa LB: > { %s1765_s12 = sadd.s32 4294967295, %s1682_s11   ;;  %s1769_s14 = sadd.s32 1, %s1682_s11   ;;  %s1682_s11 = sphi %s1753_s11, %s2170_s11   ;;  %s1678_s10 = sphi %s1751_s10, %s2169_s10   ;;  %s1674_s30 = sphi %s1749_s30, %s2168_s30  }
   0xb   : > { %s29_s15 = sshrl.u32 %s1682_s11, 3  ;;  %s30_s16 = sshrl.u32 %s1769_s14, 3 }
   0xc   : > { %s34_s17 = sadd.s32 1, %s1678_s10  ;;  %s31_s18 = ssub.s32 %s29_s15, %s30_s16 }
   0xd   : > { %p44_p0 = scmp.ne.s32.totalorder %s1678_s10, %s1674_s30  ;;  %p32_p1 = scmp.eq.s32.totalorder %s31_s18, 0 }
   0xe   : > { %p45_p2 = scmp.eq.s32.totalorder %s1765_s12, 7  ;;  %p1430_p4 = scmp.ge.s32.totalorder %s1682_s11, 8 }
   0xf   : > { %s1778_s19 = scalar_select %p32_p1, %s1678_s10, %s34_s17  }
  0x10   : > { %p1780_p3 = por %p45_p2, %p44_p0  ;;  %95 = sbr.rel (%p1430_p4) target bundleno = 29 (0x1d), region = 16 }
  0x11   : > { %2149 = sst [smem:[#allocation37_spill]] %s1778_s19  ;;  %s97_s21 = sand.u32 (!%p1430_p4), 1, %s1682_s11  }
  0x12   : > { %s1432_s22 = sshll.u32 (!%p1430_p4), %s1682_s11, 1  ;;  %s1431_s23 = sshll.u32 (!%p1430_p4), %s97_s21, 1 }
  0x13   : > { %s2151_s0 = sld [smem:[#allocation38_spill]] (!%p1430_p4)  ;;  %s99_s27 = scalar_lea.vmem (!%p1430_p4), [#allocation1], %s1431_s23 }
  0x14   : > { %s2152_s1 = sld [smem:[#allocation39_spill]] (!%p1430_p4)  ;;  %s175_s18 = scalar_lea.vmem (!%p1430_p4), %s2139_s2, %s1432_s22 }
  0x15   : > { %s136_s13 = scalar_lea.vmem (!%p1430_p4), [#allocation3], %s1431_s23  ;;  %v191_v2 = vld [vmem:[%s175_s18] sm:$0x3] (!%p1430_p4)  ;;  %s212_s24 = scalar_lea.vmem (!%p1430_p4), %s2140_s3, %s1432_s22 }
  0x16   : > { %s173_s25 = scalar_lea.vmem (!%p1430_p4), [#allocation5], %s1431_s23  ;;  %v228_v3 = vld [vmem:[%s212_s24] sm:$0x3] (!%p1430_p4) }
  0x17   : > { %192 = vst [vmem:[%s173_s25] sm:$0x3] %v191_v2 }
  0x19   : > { %s101_s26 = scalar_lea.vmem %s2151_s0, %s1432_s22 }
  0x1a   : > { %v117_v0 = vld [vmem:[%s101_s26] sm:$0x3]  ;;  %s138_s15 = scalar_lea.vmem %s2152_s1, %s1432_s22  ;;  %s210_s26 = scalar_lea.vmem [#allocation7], %s1431_s23 }
  0x1b   : > { %118 = vst [vmem:[%s99_s27] sm:$0x3] %v117_v0  ;;  %v154_v1 = vld [vmem:[%s138_s15] sm:$0x3]  ;;  %229 = vst [vmem:[%s210_s26] sm:$0x3] %v228_v3 }
  0x1c   : > { %155 = vst [vmem:[%s136_s13] sm:$0x3] %v154_v1 }
  0x1d PF: > { %p1439_p5 = scmp.ge.s32.totalorder %s1682_s11, 1  ;;  %p245_p6 = scmp.lt.s32.totalorder %s1682_s11, 9 }
  0x1f   : > { %p246_p7 = pnand %p1439_p5, %p245_p6 }
  0x21   : > { %249 = sbr.rel (%p246_p7) target bundleno = 1092 (0x444), region = 140 }
  0x28   : > { %s1802_s13 = sand.u32 1, %s1765_s12   ;;  %s286_s27 = sand.u32 1, %s1674_s30   ;;  %v350_v4 = vlaneseq  ;;  %v1692_v5 = vmov 0.0  }
  0x29   : > { %s1806_s19 = sshll.u32 %s1802_s13, 1  ;;  %s1808_s22 = sshll.u32 %s286_s27, 3  ;;  %345 = vst [vmem:[#allocation10] sm:$0xff] %v1692_v5  ;;  %346 = vst [vmem:[#allocation13] sm:$0xff] %v1692_v5 }
  0x2a   : > { %347 = vst [vmem:[#allocation16] sm:$0xff] %v1692_v5  ;;  %348 = vst [vmem:[#allocation18] sm:$0xff] %v1692_v5  ;;  %v1810_v6 = vand.u32 127, %v350_v4  ;;  %v1812_v7 = vshrl.u32 %v350_v4, 7  ;;  %s270_s23 = scalar_lea.vmem [#allocation1], %s1806_s19  ;;  %s274_s30 = scalar_lea.vmem [#allocation3], %s1806_s19 }
  0x2b   : > { %v317_v8 = vld [vmem:[%s270_s23] sm:$0x3]  ;;  %v321_v9 = vld [vmem:[%s274_s30] sm:$0x3]  ;;  %s278_s28 = scalar_lea.vmem [#allocation5], %s1806_s19  ;;  %s282_s29 = scalar_lea.vmem [#allocation7], %s1806_s19 }
  0x2c   : > { %318 = vst [vmem:[#allocation0] sm:$0x3] %v317_v8  ;;  %322 = vst [vmem:[#allocation2] sm:$0x3] %v321_v9  ;;  %v325_v10 = vld [vmem:[%s278_s28] sm:$0x3]  ;;  %v352_v6 = vmov %v1810_v6  ;;  %v355_v7 = vmov %v1812_v7 }
  0x2d   : > { %v329_v11 = vld [vmem:[%s282_s29] sm:$0x3]  ;;  %326 = vst [vmem:[#allocation4] sm:$0x3] %v325_v10  ;;  %v365_v6 = vmov %v1810_v6  ;;  %v368_v7 = vmov %v1812_v7  ;;  %s333_s15 = smov [#allocation21]  ;;  %s336_s16 = smov [#allocation22]  ;;  %vm359_vm0 = vcmp.eq.s32.totalorder %v355_v7, %v352_v6 }
  0x2e   : > { %330 = vst [vmem:[#allocation6] sm:$0x3] %v329_v11  ;;  %vm372_vm1 = vcmp.eq.s32.totalorder %v368_v7, %v365_v6  ;;  %s349_s17 = smov [#allocation10]  ;;  %s362_s18 = smov [#allocation18]  ;;  %vm1319_vm2 = vcmp.lt.s32.totalorder %v1810_v6, 2  ;;  %v1311_v6 = vmov %v1810_v6  ;;  %v1314_v7 = vmov %v1812_v7 }
  0x2f   : > { %s339_s21 = smov [#allocation23]  ;;  %s342_s24 = smov [#allocation24]  ;;  %vm1324_vm3 = vcmp.eq.s32.totalorder %v1314_v7, %v1311_v6  ;;  %v1362_v6 = vmov %v1810_v6  ;;  %v1331_v7 = vmov %v1812_v7 }
  0x30   : > { %v356_v12 = vld [vmem:[%s349_s17] sm:$0x3]  ;;  %s1315_s29 = smov [#allocation21]  ;;  %s1332_s0 = smov [#allocation22]  ;;  %v1328_v6 = vmov %v1810_v6  ;;  %v1365_v7 = vmov %v1812_v7 }
  0x31   : > { %v369_v13 = vld [vmem:[%s362_s18] sm:$0x3]  ;;  %v360_v16 = vsel %vm359_vm0, 1.0, %v356_v12  ;;  %v1345_v6 = vmov %v1810_v6  ;;  %v1348_v7 = vmov %v1812_v7  ;;  %vm1375_vm4 = vcmp.eq.s32.totalorder %v1365_v7, %v1362_v6 }
  0x32   : > { %v373_v17 = vsel %vm372_vm1, 1.0, %v369_v13  ;;  %361 = vst [vmem:[%s349_s17] sm:$0x3] %v360_v16 }
  0x33   : > { %v334_v14 = vld [vmem:[#allocation0] sm:$0xff]  ;;  %v337_v15 = vld [vmem:[#allocation2] sm:$0xff]  ;;  %374 = vst [vmem:[%s362_s18] sm:$0x3] %v373_v17 }
  0x34   : > { %335 = vst [vmem:[%s333_s15] sm:$0xff] %v334_v14  ;;  %338 = vst [vmem:[%s336_s16] sm:$0xff] %v337_v15  ;;  %v340_v18 = vld [vmem:[#allocation4] sm:$0xff]  ;;  %s1349_s15 = smov [#allocation23]  ;;  %s1366_s16 = smov [#allocation24] }
  0x35   : > { %v343_v19 = vld [vmem:[#allocation6] sm:$0xff]  ;;  %341 = vst [vmem:[%s339_s21] sm:$0xff] %v340_v18 }
  0x36   : > { %344 = vst [vmem:[%s342_s24] sm:$0xff] %v343_v19 }
  0x3b   : > { %v1321_v20 = vld [vmem:[%s1315_s29] sm:$0x3] }
  0x3c   : > { %v1338_v21 = vld [vmem:[%s1332_s0] sm:$0x3]  ;;  %v1322_v22 = vsel %vm1319_vm2, %v1321_v20, 0.0 }
  0x3d   : > { %v1339_v23 = vsel %vm1319_vm2, %v1338_v21, 0.0  ;;  %v1355_v24 = vld [vmem:[%s1349_s15] sm:$0x3]  ;;  %v1323_v26 = vmul.f32 %v1322_v22, %v1322_v22 }
  0x3e   : > { %v1372_v25 = vld [vmem:[%s1366_s16] sm:$0x3]  ;;  %v1340_v27 = vmul.f32 %v1339_v23, %v1339_v23  ;;  %v1356_v28 = vsel %vm1319_vm2, %v1355_v24, 0.0 }
  0x3f   : > { %v1373_v29 = vsel %vm1319_vm2, %v1372_v25, 0.0  ;;  %v1357_v30 = vmul.f32 %v1356_v28, %v1356_v28  ;;  %v1325_v33 = vsel %vm1324_vm3, 0.0, %v1323_v26 }
  0x40   : > { %v1342_v31 = vadd.f32 %v1340_v27, %v1323_v26  ;;  %v1374_v32 = vmul.f32 %v1373_v29, %v1373_v29  ;;  %v1341_v34 = vadd.f32 %v1340_v27, %v1325_v33 }
  0x42   : > { %v1359_v35 = vadd.f32 %v1357_v30, %v1342_v31  ;;  %v1358_v36 = vadd.f32 %v1357_v30, %v1341_v34  ;;  %v1376_v37 = vsel %vm1375_vm4, 0.0, %v1374_v32 }
  0x44   : > { %v1378_v38 = vadd.f32 %v1374_v32, %v1359_v35  ;;  %v1377_v39 = vadd.f32 %v1376_v37, %v1358_v36 }
  0x46   : > { %1379 = vadd.xlane.f32.xlu0 %v1378_v38 }
  0x4a   : > { %1387 = vadd.xlane.f32.xlu0 %v1377_v39 }
  0xd3   : > { %v1380_v40 = vpop.xlane.xlu0 %1379 }
  0xd4   : > { %v1381_v41 = vrot.slane %v1380_v40, 4 }
  0xd6   : > { %v1382_v42 = vadd.f32 %v1381_v41, %v1380_v40 }
  0xd7   : > { %v1388_v43 = vpop.xlane.xlu0 %1387 }
  0xd8   : > { %v1383_v44 = vrot.slane %v1382_v42, 2  ;;  %v1389_v45 = vrot.slane %v1388_v43, 4 }
  0xda   : > { %v1390_v46 = vadd.f32 %v1389_v45, %v1388_v43  ;;  %v1384_v47 = vadd.f32 %v1383_v44, %v1382_v42 }
  0xdc   : > { %v1391_v48 = vrot.slane %v1390_v46, 2  ;;  %v1385_v50 = vrot.slane %v1384_v47, 1 }
  0xde   : > { %v1392_v49 = vadd.f32 %v1391_v48, %v1390_v46  ;;  %v1386_v53 = vadd.f32 %v1385_v50, %v1384_v47 }
  0xe0   : > { %v1393_v51 = vrot.slane %v1392_v49, 1 }
  0xe2   : > { %v1394_v52 = vadd.f32 %v1393_v51, %v1392_v49 }
  0xe4   : > { %1480 = vpush %v1394_v52 }
  0xe5   : > { %1482 = vpush %v1386_v53 }
 0x115   : > { %s1481_s0 = spop %1480 }
 0x116   : > { %s1483_s17 = spop %1482 }
 0x117   : > { %s1397_s18 = smul.f32 1e-10, %s1483_s17 }
 0x119   : > { %p1398_p8 = scmp.le.f32.partialorder %s1481_s0, %s1397_s18 }
 0x11a   : > { %s1846_s21 = smov (!%p1398_p8), 0  }
 0x11b   : > { %1401 = sbr.rel (%p1398_p8) target bundleno = 965 (0x3c5), region = 357 }
 0x122 LB: >> { %s1851_s24 = smov 0   ;;  %s1686_s21 = sphi %s1846_s21, %s2153_s21  }
 0x123 LB: >>> { %s479_s29 = smov [#allocation21]  ;;  %v483_v6 = vmov %v1810_v6  ;;  %v486_v7 = vmov %v1812_v7  ;;  %s499_s15 = smov [#allocation22]  ;;  %vm802_vm14 = vcmp.eq.s32.totalorder %v1812_v7, 0  ;;  %vm814_vm15 = vcmp.eq.s32.totalorder %v1812_v7, 1  ;;  %s1690_s24 = sphi %s1851_s24, %s478_s24  }
 0x124   : >>> { %v503_v6 = vmov %v1810_v6  ;;  %v506_v7 = vmov %v1812_v7  ;;  %v487_v54 = vld [vmem:[%s479_s29] sm:$0x3]  ;;  %vm490_vm5 = vcmp.eq.s32.totalorder %v486_v7, %v483_v6  ;;  %s519_s16 = smov [#allocation24]  ;;  %s480_s0 = smov [#allocation25] }
 0x125   : >>> { %vm510_vm6 = vcmp.eq.s32.totalorder %v506_v7, %v503_v6  ;;  %v523_v6 = vmov %v1810_v6  ;;  %v526_v7 = vmov %v1812_v7  ;;  %v491_v55 = vsel %vm490_vm5, %v487_v54, 0.0  ;;  %v507_v56 = vld [vmem:[%s499_s15] sm:$0x3]  ;;  %s500_s17 = smov [#allocation26]  ;;  %s520_s18 = smov [#allocation27] }
 0x126   : >>> { %vm530_vm7 = vcmp.eq.s32.totalorder %v526_v7, %v523_v6  ;;  %v492_v57 = vrot.slane %v491_v55, 4  ;;  %v511_v58 = vsel %vm510_vm6, %v507_v56, 0.0  ;;  %v527_v59 = vld [vmem:[%s519_s16] sm:$0x3]  ;;  %s543_s29 = smov [#allocation26]  ;;  %s541_s15 = smov [#allocation25]  ;;  %v592_v6 = vmov %v1810_v6 }
 0x127   : >>> { %v512_v60 = vrot.slane %v511_v58, 4  ;;  %v531_v61 = vsel %vm530_vm7, %v527_v59, 0.0  ;;  %s545_s16 = smov [#allocation27]  ;;  %v595_v7 = vmov %v1812_v7  ;;  %v607_v6 = vmov %v1810_v6  ;;  %s1868_s26 = smov [#allocation22] }
 0x128   : >>> { %v493_v62 = vadd.f32 %v492_v57, %v491_v55  ;;  %v532_v63 = vrot.slane %v531_v61, 4  ;;  %v610_v7 = vmov %v1812_v7  ;;  %vm597_vm12 = vcmp.eq.s32.totalorder %v595_v7, %v592_v6  ;;  %s1870_s25 = smov [#allocation23]  ;;  %s1876_s28 = smov [#allocation13]  ;;  %v627_v54 = vld [vmem:[%s1868_s26] sm:$0x3] }
 0x129   : >>> { %v513_v0 = vadd.f32 %v512_v60, %v511_v58  ;;  %vm612_vm13 = vcmp.eq.s32.totalorder %v610_v7, %v607_v6  ;;  %s842_s30 = smov [#allocation32]  ;;  %s1882_s23 = smov [#allocation18]  ;;  %v628_v55 = vld [vmem:[%s1870_s25] sm:$0x3]  ;;  %v705_v6 = vmov %v1810_v6  ;;  %v708_v7 = vmov %v1812_v7 }
 0x12a   : >>> { %v494_v1 = vrot.slane %v493_v62, 2  ;;  %v533_v2 = vadd.f32 %v532_v63, %v531_v61  ;;  %v851_v58 = vld [vmem:[%s1876_s28] sm:$0x3]  ;;  %s620_s27 = smov [#allocation33]  ;;  %s844_s1 = smov [#allocation33]  ;;  %v719_v6 = vmov %v1810_v6  ;;  %v722_v7 = vmov %v1812_v7 }
 0x12b   : >>> { %v514_v3 = vrot.slane %v513_v0, 2  ;;  %v853_v61 = vld [vmem:[%s1882_s23] sm:$0x3]  ;;  %vm712_vm0 = vcmp.eq.s32.totalorder %v708_v7, %v705_v6  ;;  %v678_v6 = vmov %v1810_v6  ;;  %v681_v7 = vmov %v1812_v7  ;;  %s478_s24 = sadd.s32 1, %s1690_s24  }
 0x12c   : >>> { %v495_v4 = vadd.f32 %v494_v1, %v493_v62  ;;  %v534_v5 = vrot.slane %v533_v2, 2  ;;  %v692_v6 = vmov %v1810_v6  ;;  %v695_v7 = vmov %v1812_v7  ;;  %p475_p9 = scmp.ge.s32.totalorder %s478_s24, 3  }
 0x12d   : >>> { %v515_v8 = vadd.f32 %v514_v3, %v513_v0  ;;  %vm727_vm1 = vcmp.eq.s32.totalorder %v722_v7, %v719_v6  ;;  %vm686_vm3 = vcmp.eq.s32.totalorder %v681_v7, %v678_v6  ;;  %vm699_vm4 = vcmp.eq.s32.totalorder %v695_v7, %v692_v6 }
 0x12e   : >>> { %v496_v9 = vrot.slane %v495_v4, 1  ;;  %v535_v10 = vadd.f32 %v534_v5, %v533_v2  ;;  %vm741_vm5 = vcmp.eq.s32.totalorder %v1810_v6, 0  ;;  %vm745_vm6 = vcmp.eq.s32.totalorder %v1810_v6, 1 }
 0x12f   : >>> { %v516_v11 = vrot.slane %v515_v8, 1  ;;  %v379_v6 = vmov (%p475_p9), %v1810_v6  ;;  %v382_v7 = vmov (%p475_p9), %v1812_v7 }
 0x130   : >>> { %v497_v12 = vadd.f32 %v496_v9, %v495_v4  ;;  %v536_v13 = vrot.slane %v535_v10, 1  ;;  %v432_v6 = vmov (%p475_p9), %v1810_v6  ;;  %vm394_vm7 = vcmp.eq.s32.totalorder (%p475_p9), %v382_v7, %v379_v6 }
 0x131   : >>> { %v517_v14 = vadd.f32 %v516_v11, %v515_v8  ;;  %v435_v7 = vmov (%p475_p9), %v1812_v7  ;;  %v398_v6 = vmov (%p475_p9), %v1810_v6 }
 0x132   : >>> { %498 = vst [vmem:[%s480_s0] sm:$0x1] %v497_v12  ;;  %v537_v15 = vadd.f32 %v536_v13, %v535_v10  ;;  %s580_s0 = smov [#allocation28]  ;;  %v401_v7 = vmov (%p475_p9), %v1812_v7  ;;  %v415_v6 = vmov (%p475_p9), %v1810_v6 }
 0x133   : >>> { %518 = vst [vmem:[%s500_s17] sm:$0x1] %v517_v14  ;;  %s582_s17 = smov [#allocation29]  ;;  %v418_v7 = vmov (%p475_p9), %v1812_v7 }
 0x134   : >>> { %538 = vst [vmem:[%s520_s18] sm:$0x1] %v537_v15  ;;  %s539_s18 = smov [#allocation30] }
 0x135   : >>> { %s584_s18 = smov %s539_s18 }
 0x139   : >>> { %v542_v18 = vld [vmem:[%s541_s15] sm:$0xff]  ;;  %s588_s15 = smov [#allocation30] }
 0x13a   : >>> { %v544_v16 = vld [vmem:[%s543_s29] sm:$0xff]  ;;  %v565_v31 = vand.u32 2147483647, %v542_v18  ;;  %s540_s29 = smov [#allocation31] }
 0x13b   : >>> { %v548_v17 = vmul.f32 2.0, %v544_v16  ;;  %v546_v19 = vld [vmem:[%s545_s16] sm:$0xff]  ;;  %v566_v36 = vand.u32 2147483647, %v544_v16  ;;  %s586_s29 = smov %s540_s29  ;;  %s603_s16 = smov [#allocation31] }
 0x13c   : >>> { %v547_v20 = vsub.f32 %v546_v19, %v542_v18  ;;  %v567_v32 = vand.u32 2147483647, %v546_v19 }
 0x13d   : >>> { %1536 = vrcp.f32 %v548_v17 }
 0x13e   : >>> { %v568_v35 = vmin.f32 %v565_v31, %v567_v32 }
 0x140   : >>> { %v569_v37 = vmul.f32 1.1920929e-08, %v568_v35 }
 0x142   : >>> { %vm570_vm11 = vcmp.le.f32.partialorder %v566_v36, %v569_v37 }
 0x147   : >>> { %v1537_v21 = vpop.eup %1536 }
 0x148   : >>> { %v550_v22 = vmul.f32 %v1537_v21, %v547_v20 }
 0x14a   : >>> { %v552_v23 = vmul.f32 %v550_v22, %v550_v22  ;;  %vm551_vm10 = vcmp.ge.f32.partialorder %v550_v22, 0.0 }
 0x14c   : >>> { %v553_v24 = vadd.f32 1.0, %v552_v23 }
 0x14e   : >>> { %1538 = vrsqrt.f32 %v553_v24  ;;  %vm556_vm8 = vcmp.eq.f32.partialorder %v553_v24, inf  ;;  %v559_v26 = vand.u32 2147483648, %v553_v24  ;;  %vm558_vm9 = vcmp.eq.f32.partialorder %v553_v24, 0.0 }
 0x158   : >>> { %v1539_v25 = vpop.eup %1538 }
 0x159   : >>> { %v555_v27 = vmul.f32 %v1539_v25, %v553_v24 }
 0x15b   : >>> { %v557_v28 = vsel %vm556_vm8, %v553_v24, %v555_v27  ;;  %vm447_vm8 = vcmp.eq.s32.totalorder (%p475_p9), %v435_v7, %v432_v6 }
 0x15c   : >>> { %v560_v29 = vsel %vm558_vm9, %v559_v26, %v557_v28 }
 0x15d   : >>> { %v561_v30 = vxor.u32 2147483648, %v560_v29 }
 0x15f   : >>> { %v562_v33 = vsel %vm551_vm10, %v560_v29, %v561_v30 }
 0x160   : >>> { %v563_v34 = vadd.f32 %v562_v33, %v550_v22 }
 0x162   : >>> { %1540 = vrcp.f32 %v563_v34 }
 0x16c   : >>> { %v1541_v38 = vpop.eup %1540 }
 0x16d   : >>> { %v571_v39 = vsel %vm570_vm11, 0.0, %v1541_v38 }
 0x16e   : >>> { %v572_v40 = vmul.f32 %v571_v39, %v571_v39  ;;  %v576_v41 = vmul.f32 %v571_v39, %v544_v16 }
 0x170   : >>> { %v573_v42 = vadd.f32 1.0, %v572_v40  ;;  %v577_v43 = vsub.f32 %v542_v18, %v576_v41  ;;  %v579_v44 = vadd.f32 %v576_v41, %v546_v19 }
 0x172   : >>> { %1542 = vrsqrt.f32 %v573_v42  ;;  %581 = vst [vmem:[%s580_s0] sm:$0xff] %v577_v43  ;;  %583 = vst [vmem:[%s582_s17] sm:$0xff] %v579_v44  ;;  %s601_s0 = smov [#allocation32]  ;;  %s618_s17 = smov [#allocation32] }
 0x17c   : >>> { %v1543_v45 = vpop.eup %1542 }
 0x17d   : >>> { %585 = vst [vmem:[%s584_s18] sm:$0xff] %v1543_v45  ;;  %v575_v46 = vmul.f32 %v1543_v45, %v571_v39  ;;  %s1866_s18 = smov [#allocation21] }
 0x17e   : >>> { %v626_v53 = vld [vmem:[%s1866_s18] sm:$0x3] }
 0x17f   : >>> { %587 = vst [vmem:[%s586_s29] sm:$0xff] %v575_v46  ;;  %s616_s29 = smov [#allocation33] }
 0x184   : >>> { %v589_v47 = vld [vmem:[%s588_s15] ss:$0 sm:$0xff]  ;;  %s1872_s15 = smov [#allocation24] }
 0x185   : >>> { %v598_v48 = vsel %vm597_vm12, %v589_v47, 0.0  ;;  %v629_v56 = vld [vmem:[%s1872_s15] sm:$0x3] }
 0x186   : >>> { %599 = vadd.xlane.f32.xlu0 %v598_v48  ;;  %v604_v49 = vld [vmem:[%s603_s16] ss:$0 sm:$0xff]  ;;  %s1874_s16 = smov [#allocation10] }
 0x187   : >>> { %v613_v50 = vsel %vm612_vm13, %v604_v49, 0.0  ;;  %v850_v57 = vld [vmem:[%s1874_s16] sm:$0x3] }
 0x18a   : >>> { %614 = vadd.xlane.f32.xlu0 %v613_v50 }
 0x213   : >>> { %v600_v51 = vpop.xlane.xlu0 %599 }
 0x214   : >>> { %602 = vst [vmem:[%s601_s0] sm:$0xff] %v600_v51  ;;  %s1878_s0 = smov [#allocation16] }
 0x215   : >>> { %v852_v59 = vld [vmem:[%s1878_s0] sm:$0x3] }
 0x217   : >>> { %v615_v52 = vpop.xlane.xlu0 %614 }
 0x218   : >>> { %617 = vst [vmem:[%s616_s29] sm:$0xff] %v615_v52  ;;  %s1902_s29 = smov [#allocation24] }
 0x21b   : >>> { %v619_v60 = vld [vmem:[%s618_s17] sm:$0xff]  ;;  %s1900_s17 = smov [#allocation23] }
 0x21c   : >>> { %v843_v62 = vld [vmem:[%s842_s30] sm:$0xff]  ;;  %v630_v63 = vmul.f32 %v626_v53, %v619_v60  ;;  %v633_v0 = vmul.f32 %v627_v54, %v619_v60  ;;  %v637_v1 = vmul.f32 %v628_v55, %v619_v60  ;;  %v640_v2 = vmul.f32 %v629_v56, %v619_v60  ;;  %s1898_s30 = smov [#allocation10] }
 0x21d   : >>> { %v854_v3 = vmul.f32 %v850_v57, %v843_v62  ;;  %v857_v4 = vmul.f32 %v851_v58, %v843_v62  ;;  %v861_v5 = vmul.f32 %v852_v59, %v843_v62  ;;  %v864_v8 = vmul.f32 %v853_v61, %v843_v62 }
 0x21f   : >>> { %v621_v9 = vld [vmem:[%s620_s27] sm:$0xff]  ;;  %s648_s27 = smov [#allocation31] }
 0x220   : >>> { %v845_v10 = vld [vmem:[%s844_s1] sm:$0xff]  ;;  %v631_v11 = vmul.f32 %v628_v55, %v621_v9  ;;  %v634_v12 = vmul.f32 %v629_v56, %v621_v9  ;;  %v636_v13 = vmul.f32 %v626_v53, %v621_v9  ;;  %v639_v14 = vmul.f32 %v627_v54, %v621_v9  ;;  %s646_s1 = smov [#allocation30] }
 0x221   : >>> { %v855_v15 = vmul.f32 %v852_v59, %v845_v10  ;;  %v858_v16 = vmul.f32 %v853_v61, %v845_v10  ;;  %v860_v17 = vmul.f32 %v850_v57, %v845_v10  ;;  %v863_v18 = vmul.f32 %v851_v58, %v845_v10  ;;  %v647_v27 = vld [vmem:[%s646_s1] ss:$0 sm:$0xff]  ;;  %s675_s1 = smov [#allocation28] }
 0x222   : >>> { %v632_v19 = vsub.f32 %v630_v63, %v631_v11  ;;  %v635_v20 = vsub.f32 %v633_v0, %v634_v12  ;;  %v638_v21 = vadd.f32 %v637_v1, %v636_v13  ;;  %v641_v22 = vadd.f32 %v640_v2, %v639_v14  ;;  %v649_v28 = vld [vmem:[%s648_s27] ss:$0 sm:$0xff]  ;;  %s674_s27 = smov [#allocation21] }
 0x223   : >>> { %v856_v23 = vsub.f32 %v854_v3, %v855_v15  ;;  %v859_v24 = vsub.f32 %v857_v4, %v858_v16  ;;  %v862_v25 = vadd.f32 %v861_v5, %v860_v17  ;;  %v865_v26 = vadd.f32 %v864_v8, %v863_v18  ;;  %v682_v63 = vld [vmem:[%s675_s1] ss:$0 sm:$0xff]  ;;  %s918_s1 = sadd.s32 (%p475_p9), 1, %s1686_s21  }
 0x224   : >>> { %643 = vst [vmem:[%s1868_s26] sm:$0x3] %v635_v20  ;;  %645 = vst [vmem:[%s1872_s15] sm:$0x3] %v641_v22  ;;  %s1904_s26 = smov [#allocation21]  ;;  %s716_s15 = smov [#allocation29] }
 0x225   : >>> { %642 = vst [vmem:[%s1866_s18] sm:$0x3] %v632_v19  ;;  %644 = vst [vmem:[%s1870_s25] sm:$0x3] %v638_v21  ;;  %s1906_s25 = smov [#allocation16]  ;;  %s1914_s18 = smov [#allocation22]  ;;  %v723_v59 = vld [vmem:[%s716_s15] ss:$0 sm:$0xff] }
 0x226   : >>> { %866 = vst [vmem:[%s1874_s16] sm:$0x3] %v856_v23  ;;  %867 = vst [vmem:[%s1876_s28] sm:$0x3] %v859_v24  ;;  %s1908_s28 = smov [#allocation13]  ;;  %s702_s16 = smov [#allocation23] }
 0x227   : >>> { %868 = vst [vmem:[%s1878_s0] sm:$0x3] %v862_v25  ;;  %869 = vst [vmem:[%s1882_s23] sm:$0x3] %v865_v26  ;;  %s1912_s23 = smov [#allocation18]  ;;  %s715_s0 = smov [#allocation24] }
 0x228   : >>> { %s818_s15 = smov [#allocation22]  ;;  %p471_p10 = scmp.ge.s32.totalorder (%p475_p9), %s918_s1, 15 }
 0x229   : >> { %s2153_s21 = smov (%p475_p9), %s918_s1 }
 0x22b   : >>> { %v657_v30 = vld [vmem:[%s1902_s29] sm:$0x3] }
 0x22c   : >>> { %v656_v29 = vld [vmem:[%s1900_s17] sm:$0x3]  ;;  %v665_v36 = vmul.f32 %v657_v30, %v649_v28  ;;  %v668_v42 = vmul.f32 %v657_v30, %v647_v27 }
 0x22d   : >>> { %v654_v31 = vld [vmem:[%s1904_s26] sm:$0x3]  ;;  %v664_v35 = vmul.f32 %v656_v29, %v647_v27  ;;  %v667_v37 = vmul.f32 %v656_v29, %v649_v28 }
 0x22e   : >>> { %v872_v32 = vld [vmem:[%s1898_s30] ss:$0 sm:$0xff]  ;;  %v1459_v34 = vld [vmem:[%s1898_s30 + $0x1] ss:$0 sm:$0xff]  ;;  %v658_v48 = vmul.f32 %v654_v31, %v647_v27  ;;  %v661_v49 = vmul.f32 %v654_v31, %v649_v28 }
 0x22f   : >>> { %v1458_v33 = vld [vmem:[%s1898_s30 - $0x1] sm:$0x2]  ;;  %v1461_v40 = vld [vmem:[%s1906_s25 + $0x1] sm:$0x1]  ;;  %v666_v47 = vsub.f32 %v664_v35, %v665_v36  ;;  %v669_v53 = vadd.f32 %v668_v42, %v667_v37 }
 0x230   : >>> { %v879_v38 = vsel %vm802_vm14, %v872_v32, %v1458_v33  ;;  %v883_v39 = vld [vmem:[%s1906_s25] ss:$0 sm:$0xff]  ;;  %v891_v43 = vsel %vm814_vm15, %v1459_v34, %v1461_v40  ;;  %v1463_v45 = vld [vmem:[%s1908_s28 + $0x1] ss:$0 sm:$0xff] }
 0x231   : >>> { %v896_v41 = vld [vmem:[%s1908_s28] ss:$0 sm:$0xff]  ;;  %882 = vst [vmem:[%s1898_s30] sm:$0x3] %v879_v38  ;;  %893 = vst [vmem:[%s1906_s25] sm:$0x3] %v891_v43  ;;  %v1465_v51 = vld [vmem:[%s1912_s23 + $0x1] sm:$0x1] }
 0x232   : >>> { %v1462_v44 = vld [vmem:[%s1908_s28 - $0x1] sm:$0x2]  ;;  %1460 = vst [vmem:[%s1898_s30 + $0x1] sm:$0x1] %v883_v39  ;;  %v915_v54 = vsel %vm814_vm15, %v1463_v45, %v1465_v51  ;;  %672 = vst [vmem:[%s1900_s17] sm:$0x3] %v666_v47  ;;  %s689_s30 = smov [#allocation22] }
 0x233   : >>> { %v907_v46 = vld [vmem:[%s1912_s23] ss:$0 sm:$0xff]  ;;  %v903_v50 = vsel %vm802_vm14, %v896_v41, %v1462_v44  ;;  %673 = vst [vmem:[%s1902_s29] sm:$0x3] %v669_v53  ;;  %s1956_s17 = smov [#allocation23]  ;;  %s1693_s29 = smov 1  }
 0x234   : >>> { %v655_v52 = vld [vmem:[%s1914_s18] sm:$0x3]  ;;  %906 = vst [vmem:[%s1908_s28] sm:$0x3] %v903_v50  ;;  %917 = vst [vmem:[%s1912_s23] sm:$0x3] %v915_v54  ;;  %s731_s25 = smov [#allocation22]  ;;  %s1959_s23 = smov [#allocation24] }
 0x235   : >>> { %v659_v55 = vmul.f32 %v655_v52, %v649_v28  ;;  %v662_v56 = vmul.f32 %v655_v52, %v647_v27  ;;  %1464 = vst [vmem:[%s1908_s28 + $0x1] sm:$0x1] %v907_v46  ;;  %s1694_s28 = smov 127  }
 0x237   : >>> { %v660_v57 = vsub.f32 %v658_v48, %v659_v55  ;;  %v663_v58 = vadd.f32 %v662_v56, %v661_v49 }
 0x239   : >>> { %670 = vst [vmem:[%s1904_s26] sm:$0x3] %v660_v57  ;;  %671 = vst [vmem:[%s1914_s18] sm:$0x3] %v663_v58  ;;  %v709_v60 = vld [vmem:[%s702_s16] sm:$0x3]  ;;  %s730_s26 = smov [#allocation21]  ;;  %s794_s18 = smov [#allocation21] }
 0x23a   : >>> { %v713_v61 = vsel %vm712_vm0, 0.0, %v709_v60  ;;  %v724_v62 = vld [vmem:[%s715_s0] sm:$0x3] }
 0x23b   : >>> { %714 = vst [vmem:[%s702_s16] sm:$0x3] %v713_v61  ;;  %v728_v0 = vsel %vm727_vm1, %v723_v59, %v724_v62  ;;  %s795_s16 = smov [#allocation23] }
 0x23c   : >>> { %729 = vst [vmem:[%s715_s0] sm:$0x3] %v728_v0  ;;  %s819_s0 = smov [#allocation24] }
 0x240   : >>> { %v683_v1 = vld [vmem:[%s674_s27] sm:$0x3] }
 0x241   : >>> { %v696_v2 = vld [vmem:[%s689_s30] sm:$0x3]  ;;  %v687_v3 = vsel %vm686_vm3, %v682_v63, %v683_v1 }
 0x242   : >>> { %v700_v4 = vsel %vm699_vm4, 0.0, %v696_v2  ;;  %688 = vst [vmem:[%s674_s27] sm:$0x3] %v687_v3  ;;  %v768_v5 = vld [vmem:[%s1956_s17] sm:$0x3]  ;;  %s383_s27 = smov (%p475_p9), [#allocation21] }
 0x243   : >>> { %701 = vst [vmem:[%s689_s30] sm:$0x3] %v700_v4  ;;  %769 = vrot.lane.b32.xlu0 %v768_v5, %s1693_s29  ;;  %v764_v11 = vld [vmem:[%s1959_s23] sm:$0x3]  ;;  %s402_s30 = smov (%p475_p9), [#allocation22] }
 0x244   : >>> { %v785_v12 = vld [vmem:[%s1959_s23] sm:$0x3] }
 0x245   : >>> { %v767_v30 = vld [vmem:[%s1956_s17] sm:$0x3] }
 0x249   : >>> { %v736_v8 = vld [vmem:[%s730_s26] sm:$0x3] }
 0x24a   : >>> { %737 = vrot.lane.b32.xlu1 %v736_v8, %s1693_s29  ;;  %v732_v9 = vld [vmem:[%s731_s25] sm:$0x3] }
 0x24b   : >>> { %v753_v10 = vld [vmem:[%s731_s25] sm:$0x3] }
 0x24c   : >>> { %v735_v18 = vld [vmem:[%s730_s26] sm:$0x3] }
 0x24e   : >>> { %733 = vrot.lane.b32.xlu1 %v732_v9, %s1693_s29 }
 0x252   : >>> { %754 = vrot.lane.b32.xlu1 %v753_v10, %s1694_s28 }
 0x256   : >>> { %765 = vrot.lane.b32.xlu1 %v764_v11, %s1693_s29  ;;  %s436_s29 = smov (%p475_p9), [#allocation24] }
 0x25a   : >>> { %786 = vrot.lane.b32.xlu1 %v785_v12, %s1694_s28 }
 0x2b5   : >>> { %v770_v20 = vpop.permute.xlu0 %769 }
 0x2b6   : >>> { %v774_v22 = vsel %vm741_vm5, %v768_v5, %v770_v20 }
 0x2bc   : >>> { %v738_v13 = vpop.permute.xlu1 %737 }
 0x2bd   : >>> { %v742_v14 = vsel %vm741_vm5, %v736_v8, %v738_v13 }
 0x2c0   : >>> { %v734_v15 = vpop.permute.xlu1 %733 }
 0x2c1   : >>> { %v746_v16 = vsel %vm745_vm6, %v734_v15, %v742_v14 }
 0x2c2   : >>> { %v752_v17 = vsel %vm1319_vm2, %v746_v16, 0.0 }
 0x2c3   : >>> { %760 = vst [vmem:[%s730_s26] sm:$0x3] %v752_v17 }
 0x2c4   : >>> { %v755_v19 = vpop.permute.xlu1 %754 }
 0x2c5   : >>> { %v759_v21 = vsel %vm745_vm6, %v735_v18, %v755_v19 }
 0x2c6   : >>> { %761 = vst [vmem:[%s731_s25] sm:$0x3] %v759_v21 }
 0x2c8   : >>> { %v766_v23 = vpop.permute.xlu1 %765 }
 0x2c9   : >>> { %v778_v24 = vsel %vm745_vm6, %v766_v23, %v774_v22 }
 0x2ca   : >>> { %v796_v25 = vld [vmem:[%s794_s18] ss:$0 sm:$0xff]  ;;  %v1451_v27 = vld [vmem:[%s794_s18 + $0x1] ss:$0 sm:$0xff]  ;;  %v784_v29 = vsel %vm1319_vm2, %v778_v24, 0.0 }
 0x2cb   : >>> { %v1450_v26 = vld [vmem:[%s794_s18 - $0x1] sm:$0x2]  ;;  %792 = vst [vmem:[%s1956_s17] sm:$0x3] %v784_v29  ;;  %s419_s17 = smov (%p475_p9), [#allocation23] }
 0x2cc   : >>> { %v803_v28 = vsel %vm802_vm14, %v796_v25, %v1450_v26  ;;  %v787_v31 = vpop.permute.xlu1 %786 }
 0x2cd   : >>> { %806 = vst [vmem:[%s794_s18] sm:$0x3] %v803_v28  ;;  %v820_v32 = vld [vmem:[%s818_s15] ss:$0 sm:$0xff]  ;;  %v1455_v34 = vld [vmem:[%s818_s15 + $0x1] ss:$0 sm:$0xff]  ;;  %v791_v35 = vsel %vm745_vm6, %v767_v30, %v787_v31 }
 0x2ce   : >>> { %v1454_v33 = vld [vmem:[%s818_s15 - $0x1] sm:$0x2]  ;;  %793 = vst [vmem:[%s1959_s23] sm:$0x3] %v791_v35 }
 0x2cf   : >>> { %v827_v36 = vsel %vm802_vm14, %v820_v32, %v1454_v33 }
 0x2d0   : >>> { %830 = vst [vmem:[%s818_s15] sm:$0x3] %v827_v36 }
 0x2d2   : >>> { %v807_v37 = vld [vmem:[%s795_s16] ss:$0 sm:$0xff]  ;;  %v1453_v38 = vld [vmem:[%s795_s16 + $0x1] sm:$0x1] }
 0x2d3   : >>> { %1452 = vst [vmem:[%s794_s18 + $0x1] sm:$0x1] %v807_v37  ;;  %v815_v39 = vsel %vm814_vm15, %v1451_v27, %v1453_v38  ;;  %477 = sbr.rel (!%p475_p9) target bundleno = 291 (0x123), region = 352 }
 0x2d4   : >>> { %817 = vst [vmem:[%s795_s16] sm:$0x3] %v815_v39 }
 0x2d5   : >>> { %v831_v40 = vld [vmem:[%s819_s0] ss:$0 sm:$0xff]  ;;  %v1457_v41 = vld [vmem:[%s819_s0 + $0x1] sm:$0x1] }
 0x2d6   : >>> { %1456 = vst [vmem:[%s818_s15 + $0x1] sm:$0x1] %v831_v40  ;;  %v839_v42 = vsel %vm814_vm15, %v1455_v34, %v1457_v41 }
 0x2d7   : >>> { %841 = vst [vmem:[%s819_s0] sm:$0x3] %v839_v42 }
 0x2da   : >> { %v389_v43 = vld [vmem:[%s383_s27] sm:$0x3] }
 0x2db   : >> { %v390_v45 = vsel %vm1319_vm2, %v389_v43, 0.0  ;;  %v425_v47 = vld [vmem:[%s419_s17] sm:$0x3] }
 0x2dc   : >> { %v391_v49 = vmul.f32 %v390_v45, %v390_v45  ;;  %v426_v51 = vsel %vm1319_vm2, %v425_v47, 0.0 }
 0x2dd   : >> { %v408_v44 = vld [vmem:[%s402_s30] sm:$0x3]  ;;  %v427_v53 = vmul.f32 %v426_v51, %v426_v51 }
 0x2de   : >> { %v409_v46 = vsel %vm1319_vm2, %v408_v44, 0.0  ;;  %v442_v48 = vld [vmem:[%s436_s29] sm:$0x3]  ;;  %v395_v56 = vsel %vm394_vm7, 0.0, %v391_v49 }
 0x2df   : >> { %v410_v50 = vmul.f32 %v409_v46, %v409_v46  ;;  %v443_v52 = vsel %vm1319_vm2, %v442_v48, 0.0 }
 0x2e0   : >> { %v444_v55 = vmul.f32 %v443_v52, %v443_v52 }
 0x2e1   : >> { %v412_v54 = vadd.f32 %v410_v50, %v391_v49  ;;  %v411_v57 = vadd.f32 %v410_v50, %v395_v56 }
 0x2e2   : >> { %v448_v60 = vsel %vm447_vm8, 0.0, %v444_v55 }
 0x2e3   : >> { %v429_v58 = vadd.f32 %v427_v53, %v412_v54  ;;  %v428_v59 = vadd.f32 %v427_v53, %v411_v57 }
 0x2e5   : >> { %v450_v61 = vadd.f32 %v444_v55, %v429_v58  ;;  %v449_v62 = vadd.f32 %v448_v60, %v428_v59 }
 0x2e7   : >> { %451 = vadd.xlane.f32.xlu0 %v450_v61 }
 0x2eb   : >> { %459 = vadd.xlane.f32.xlu0 %v449_v62 }
 0x374   : >> { %v452_v63 = vpop.xlane.xlu0 %451 }
 0x375   : >> { %v453_v0 = vrot.slane %v452_v63, 4 }
 0x377   : >> { %v454_v1 = vadd.f32 %v453_v0, %v452_v63 }
 0x378   : >> { %v460_v2 = vpop.xlane.xlu0 %459 }
 0x379   : >> { %v455_v3 = vrot.slane %v454_v1, 2  ;;  %v461_v4 = vrot.slane %v460_v2, 4 }
 0x37b   : >> { %v462_v5 = vadd.f32 %v461_v4, %v460_v2  ;;  %v456_v8 = vadd.f32 %v455_v3, %v454_v1 }
 0x37d   : >> { %v463_v9 = vrot.slane %v462_v5, 2  ;;  %v457_v11 = vrot.slane %v456_v8, 1 }
 0x37f   : >> { %v464_v10 = vadd.f32 %v463_v9, %v462_v5  ;;  %v458_v14 = vadd.f32 %v457_v11, %v456_v8 }
 0x381   : >> { %v465_v12 = vrot.slane %v464_v10, 1 }
 0x383   : >> { %v466_v13 = vadd.f32 %v465_v12, %v464_v10 }
 0x385   : >> { %1484 = vpush %v466_v13 }
 0x386   : >> { %1486 = vpush %v458_v14 }
 0x3b6   : >> { %s1485_s24 = spop %1484 }
 0x3b7   : >> { %s1487_s26 = spop %1486 }
 0x3b8   : >> { %s469_s25 = smul.f32 1e-10, %s1487_s26 }
 0x3ba   : >> { %p470_p11 = scmp.le.f32.partialorder %s1485_s24, %s469_s25 }
 0x3bc   : >> { %p472_p12 = por %p471_p10, %p470_p11 }
 0x3be   : > { %920 = sbr.rel (!%p472_p12) target bundleno = 290 (0x122), region = 363 }
 0x3c5 PF: > { %s925_s28 = smov [#allocation21]  ;;  %v929_v6 = vmov %v1810_v6  ;;  %v932_v7 = vmov %v1812_v7  ;;  %v968_v15 = vld [vmem:[#allocation10] sm:$0x3]  ;;  %v974_v16 = vld [vmem:[#allocation13] sm:$0x3]  ;;  %s2154_s21 = scalar_lea.vmem [#allocation11], %s1806_s19 }
 0x3c6   : > { %v949_v6 = vmov %v1810_v6  ;;  %v952_v7 = vmov %v1812_v7  ;;  %v933_v17 = vld [vmem:[%s925_s28] sm:$0x3]  ;;  %vm936_vm9 = vcmp.eq.s32.totalorder %v932_v7, %v929_v6  ;;  %970 = vst [vmem:[%s2154_s21] sm:$0x3] %v968_v15  ;;  %s2155_s23 = scalar_lea.vmem [#allocation14], %s1806_s19  ;;  %v980_v18 = vld [vmem:[#allocation16] sm:$0x3] }
 0x3c7   : > { %vm956_vm10 = vcmp.eq.s32.totalorder %v952_v7, %v949_v6  ;;  %976 = vst [vmem:[%s2155_s23] sm:$0x3] %v974_v16  ;;  %v986_v19 = vld [vmem:[#allocation18] sm:$0x3]  ;;  %v937_v20 = vsel %vm936_vm9, %v933_v17, 0.0  ;;  %s945_s18 = smov [#allocation24]  ;;  %s2156_s15 = scalar_lea.vmem [#allocation17], %s1806_s19 }
 0x3c8   : > { %982 = vst [vmem:[%s2156_s15] sm:$0x3] %v980_v18  ;;  %s2157_s16 = scalar_lea.vmem [#allocation19], %s1806_s19  ;;  %v938_v21 = vrot.slane %v937_v20, 4  ;;  %v953_v22 = vld [vmem:[%s945_s18] sm:$0x3]  ;;  %s921_s0 = sand.u32 7, %s1765_s12  }
 0x3c9   : > { %988 = vst [vmem:[%s2157_s16] sm:$0x3] %v986_v19  ;;  %v957_v23 = vsel %vm956_vm10, %v953_v22, 0.0  ;;  %s2158_s1 = scalar_lea.vmem [#allocation8], %s1808_s22  ;;  %s2159_s30 = scalar_lea.vmem [#allocation9], %s1808_s22 }
 0x3ca   : > { %v939_v24 = vadd.f32 %v938_v21, %v937_v20  ;;  %v958_v25 = vrot.slane %v957_v23, 4  ;;  %s922_s27 = scalar_lea.vmem %s2158_s1, %s921_s0 [#allocation8]  ;;  %s924_s17 = scalar_lea.vmem %s2159_s30, %s921_s0 [#allocation9] }
 0x3cb   : > { %s926_s27 = smov %s922_s27  ;;  %s946_s17 = smov %s924_s17 }
 0x3cc   : > { %v940_v6 = vrot.slane %v939_v24, 2  ;;  %v959_v7 = vadd.f32 %v958_v25, %v957_v23  ;;  %s998_s29 = scalar_lea.sflag [#allocation12], %s1802_s13  ;;  %s1003_s24 = scalar_lea.sflag [#allocation15], %s1802_s13 }
 0x3cd   : > { %s1013_s26 = scalar_lea.sflag [#allocation20], %s1802_s13  ;;  %s1020_s25 = sshrl.u32 (%p1780_p3), %s1765_s12, 3 }
 0x3ce   : > { %v941_v26 = vadd.f32 %v940_v6, %v939_v24  ;;  %v960_v27 = vrot.slane %v959_v7, 2  ;;  %s2160_s28 = scalar_lea.vmem (%p1780_p3), [#allocation8], %s1808_s22  ;;  %s1472_s21 = sshll.u32 (%p1780_p3), %s1020_s25, 3 }
 0x3cf   : > { %s1022_s15 = scalar_lea.vmem (%p1780_p3), %s2141_s4, %s1472_s21 }
 0x3d0   : > { %v942_v28 = vrot.slane %v941_v26, 1  ;;  %v961_v29 = vadd.f32 %v960_v27, %v959_v7  ;;  %1019 = sbr.rel (!%p1780_p3) target bundleno = 989 (0x3dd), region = 158 }
 0x3d2   : > { %v943_v30 = vadd.f32 %v942_v28, %v941_v26  ;;  %v962_v31 = vrot.slane %v961_v29, 1 }
 0x3d4   : > { %944 = vst [vmem:[%s926_s27] sm:$0x1] %v943_v30  ;;  %v963_v32 = vadd.f32 %v962_v31, %v961_v29 }
 0x3d6   : > { %964 = vst [vmem:[%s946_s17] sm:$0x1] %v963_v32 }
 0x3db   : > { %v1050_v33 = vld [vmem:[%s2160_s28] sm:$0xff] }
 0x3dc   : > { %1051 = vst [vmem:[%s1022_s15] sm:$0xff] %v1050_v33 }
 0x3dd PF: > { %1057 = sbr.rel (!%p1780_p3) target bundleno = 997 (0x3e5), region = 196  ;;  %s1058_s16 = sshrl.u32 (%p1780_p3), %s1765_s12, 3 }
 0x3de   : > { %s2161_s0 = scalar_lea.vmem (%p1780_p3), [#allocation9], %s1808_s22  ;;  %s1473_s1 = sshll.u32 (%p1780_p3), %s1058_s16, 3 }
 0x3df   : > { %s1060_s17 = scalar_lea.vmem (%p1780_p3), %s2142_s5, %s1473_s1 }
 0x3e3   : > { %v1088_v34 = vld [vmem:[%s2161_s0] sm:$0xff] (%p1780_p3) }
 0x3e4   : > { %1089 = vst [vmem:[%s1060_s17] sm:$0xff] %v1088_v34 }
 0x3e5 PF: > { %s2052_s25 = sshll.u32 %s1765_s12, 5  ;;  %s2162_s28 = scalar_lea.vmem [#allocation14], %s1806_s19 }
 0x3e6   : > { %s1109_s20 = sshll.u32 %s2162_s28, 4  ;;  %s1107_s18 = scalar_lea.hbm %s2144_s7, %s2052_s25  ;;  %s1110_s20 = int_to_ptr.vmem [resolvable:$true] %s1109_s20 }
 0x3e7   : > { %s1544_s22 = scalar_lea.vmem %s1110_s20, 32  ;;  %s1695_s15 = smov [#allocation14]  }
 0x3e8   : > { %p1545_p13 = scmp.ne.s32.totalorder %s1110_s20, %s1544_s22  ;;  %s1546_s16 = sshll.u32 %s1695_s15, 4  ;;  %s1547_s16 = int_to_ptr.vmem [resolvable:$false] %s1546_s16 }
 0x3e9   : > { %s1548_s0 = scalar_lea.vmem %s1547_s16, 64  ;;  %p1549_p0 = scmp.lt.s32.totalorder %s1110_s20, %s1547_s16 }
 0x3ea   : > { %p1550_p1 = scmp.lt.s32.totalorder %s1548_s0, %s1544_s22 }
 0x3ec   : > { %p1551_p2 = por %p1550_p1, %p1549_p0 }
 0x3ee   : > { %p1552_p3 = pnand %p1551_p2, %p1545_p13 }
 0x3f0   : > { %1555 = shalt.err (!%p1552_p3)
}
 0x3f1   : > { %s1556_s12 = scalar_lea.hbm %s1107_s18, 32  ;;  %s1558_s30 = scalar_lea.hbm %s2144_s7, 256 }
 0x3f2   : > { %p1557_p4 = scmp.ne.s32.totalorder %s1107_s18, %s1556_s12  ;;  %p1559_p5 = scmp.lt.u32.totalorder %s1107_s18, %s2144_s7 }
 0x3f3   : > { %p1560_p6 = scmp.lt.u32.totalorder %s1558_s30, %s1556_s12  ;;  %p1562_p8 = scmp.lt.u32.totalorder %s1556_s12, %s1107_s18 }
 0x3f5   : > { %p1561_p7 = por %p1560_p6, %p1559_p5 }
 0x3f7   : > { %p1563_p9 = por %p1562_p8, %p1561_p7 }
 0x3f9   : > { %p1564_p10 = pnand %p1563_p9, %p1557_p4 }
 0x3fb   : > { %1567 = shalt.err (!%p1564_p10)
}
 0x3fc   : > { %1112 = dma.vmem_to_hbm [thread:$0]  %s1110_s20, 32, %s1107_s18, %s1003_s24  }
 0x3fd   : > { %s1097_s22 = scalar_lea.hbm %s2143_s6, %s2052_s25  ;;  %s2163_s15 = scalar_lea.vmem [#allocation11], %s1806_s19 }
 0x3fe   : > { %s1099_s16 = sshll.u32 %s2163_s15, 4  ;;  %s2078_s12 = scalar_lea.hbm %s2145_s8, %s2052_s25  ;;  %s1100_s16 = int_to_ptr.vmem [resolvable:$true] %s1099_s16 }
 0x3ff   : > { %s1568_s27 = scalar_lea.vmem %s1100_s16, 32  ;;  %s1696_s30 = smov [#allocation11]  }
 0x400   : > { %p1569_p11 = scmp.ne.s32.totalorder %s1100_s16, %s1568_s27  ;;  %s1570_s17 = sshll.u32 %s1696_s30, 4  ;;  %s1571_s17 = int_to_ptr.vmem [resolvable:$false] %s1570_s17 }
 0x401   : > { %s1572_s28 = scalar_lea.vmem %s1571_s17, 64  ;;  %p1573_p12 = scmp.lt.s32.totalorder %s1100_s16, %s1571_s17 }
 0x402   : > { %p1574_p13 = scmp.lt.s32.totalorder %s1572_s28, %s1568_s27 }
 0x404   : > { %p1575_p0 = por %p1574_p13, %p1573_p12 }
 0x406   : > { %p1576_p1 = pnand %p1575_p0, %p1569_p11 }
 0x408   : > { %1579 = shalt.err (!%p1576_p1)
}
 0x409   : > { %s1580_s20 = scalar_lea.hbm %s1097_s22, 32  ;;  %s1582_s23 = scalar_lea.hbm %s2143_s6, 256 }
 0x40a   : > { %p1581_p2 = scmp.ne.s32.totalorder %s1097_s22, %s1580_s20  ;;  %p1583_p3 = scmp.lt.u32.totalorder %s1097_s22, %s2143_s6 }
 0x40b   : > { %p1584_p4 = scmp.lt.u32.totalorder %s1582_s23, %s1580_s20  ;;  %p1586_p6 = scmp.lt.u32.totalorder %s1580_s20, %s1097_s22 }
 0x40d   : > { %p1585_p5 = por %p1584_p4, %p1583_p3 }
 0x40f   : > { %p1587_p7 = por %p1586_p6, %p1585_p5 }
 0x411   : > { %p1588_p8 = pnand %p1587_p7, %p1581_p2 }
 0x413   : > { %1591 = shalt.err (!%p1588_p8)
}
 0x414   : > { %1102 = dma.vmem_to_hbm [thread:$0]  %s1100_s16, 32, %s1097_s22, %s998_s29  }
 0x415   : > { %s2164_s1 = scalar_lea.vmem [#allocation17], %s1806_s19  ;;  %s2094_s28 = scalar_lea.hbm %s2146_s9, %s2052_s25 }
 0x416   : > { %s1119_s27 = sshll.u32 %s2164_s1, 4  ;;  %s2165_s18 = scalar_lea.vmem [#allocation19], %s1806_s19  ;;  %s1120_s27 = int_to_ptr.vmem [resolvable:$true] %s1119_s27 }
 0x417   : > { %s1129_s21 = sshll.u32 %s2165_s18, 4  ;;  %s1592_s20 = scalar_lea.vmem %s1120_s27, 32  ;;  %s1130_s21 = int_to_ptr.vmem [resolvable:$true] %s1129_s21 }
 0x418   : > { %p1593_p9 = scmp.ne.s32.totalorder %s1120_s27, %s1592_s20  ;;  %s1697_s23 = smov [#allocation17]  }
 0x419   : > { %s1594_s15 = sshll.u32 %s1697_s23, 4  ;;  %s1595_s15 = int_to_ptr.vmem [resolvable:$false] %s1594_s15 }
 0x41a   : > { %s1596_s0 = scalar_lea.vmem %s1595_s15, 64  ;;  %p1597_p10 = scmp.lt.s32.totalorder %s1120_s27, %s1595_s15 }
 0x41b   : > { %p1598_p11 = scmp.lt.s32.totalorder %s1596_s0, %s1592_s20 }
 0x41d   : > { %p1599_p12 = por %p1598_p11, %p1597_p10 }
 0x41f   : > { %p1600_p13 = pnand %p1599_p12, %p1593_p9 }
 0x421   : > { %1603 = shalt.err (!%p1600_p13)
}
 0x422   : > { %s1604_s29 = scalar_lea.hbm %s2078_s12, 32  ;;  %s1606_s22 = scalar_lea.hbm %s2145_s8, 256 }
 0x423   : > { %p1605_p0 = scmp.ne.s32.totalorder %s2078_s12, %s1604_s29  ;;  %p1607_p1 = scmp.lt.u32.totalorder %s2078_s12, %s2145_s8 }
 0x424   : > { %p1608_p2 = scmp.lt.u32.totalorder %s1606_s22, %s1604_s29  ;;  %p1610_p4 = scmp.lt.u32.totalorder %s1604_s29, %s2078_s12 }
 0x426   : > { %p1609_p3 = por %p1608_p2, %p1607_p1 }
 0x428   : > { %p1611_p5 = por %p1610_p4, %p1609_p3 }
 0x42a   : > { %p1612_p6 = pnand %p1611_p5, %p1605_p0 }
 0x42c   : > { %1615 = shalt.err (!%p1612_p6)
}
 0x42d   : > { %1122 = dma.vmem_to_hbm [thread:$0]  %s1120_s27, 32, %s2078_s12, %s1003_s24  }
 0x42e   : > { %s1616_s30 = scalar_lea.vmem %s1130_s21, 32  ;;  %s1698_s17 = smov [#allocation19]  }
 0x42f   : > { %p1617_p7 = scmp.ne.s32.totalorder %s1130_s21, %s1616_s30  ;;  %s1618_s18 = sshll.u32 %s1698_s17, 4  ;;  %s1619_s18 = int_to_ptr.vmem [resolvable:$false] %s1618_s18 }
 0x430   : > { %s1620_s20 = scalar_lea.vmem %s1619_s18, 64  ;;  %p1621_p8 = scmp.lt.s32.totalorder %s1130_s21, %s1619_s18 }
 0x431   : > { %p1622_p9 = scmp.lt.s32.totalorder %s1620_s20, %s1616_s30 }
 0x433   : > { %p1623_p10 = por %p1622_p9, %p1621_p8 }
 0x435   : > { %p1624_p11 = pnand %p1623_p10, %p1617_p7 }
 0x437   : > { %1627 = shalt.err (!%p1624_p11)
}
 0x438   : > { %s1628_s23 = scalar_lea.hbm %s2094_s28, 32  ;;  %s1630_s12 = scalar_lea.hbm %s2146_s9, 256 }
 0x439   : > { %p1629_p12 = scmp.ne.s32.totalorder %s2094_s28, %s1628_s23  ;;  %p1631_p13 = scmp.lt.u32.totalorder %s2094_s28, %s2146_s9 }
 0x43a   : > { %p1632_p0 = scmp.lt.u32.totalorder %s1630_s12, %s1628_s23  ;;  %p1634_p2 = scmp.lt.u32.totalorder %s1628_s23, %s2094_s28 }
 0x43c   : > { %p1633_p1 = por %p1632_p0, %p1631_p13 }
 0x43e   : > { %p1635_p3 = por %p1634_p2, %p1633_p1 }
 0x440   : > { %p1636_p4 = pnand %p1635_p3, %p1629_p12 }
 0x442   : > { %1639 = shalt.err (!%p1636_p4)
}
 0x443   : > { %1132 = dma.vmem_to_hbm [thread:$0]  %s1130_s21, 32, %s2094_s28, %s1013_s26  }
 0x444 PF: > { %p1492_p5 = scmp.ge.s32.totalorder %s1682_s11, 2  ;;  %s2166_s29 = sadd.s32 4294967294, %s1682_s11  }
 0x445   : > { %s1152_s25 = sand.u32 1, %s2166_s29  }
 0x446   : > { %s1153_s19 = scalar_lea.sflag [#allocation12], %s1152_s25 }
 0x447   : > { %1661 = dma.done.wait (%p1492_p5), %s1153_s19, 32  }
 0x448   : > { %1663 = vsyncadd (%p1492_p5), %s1153_s19, 4294967264  ;;  %s1159_s22 = scalar_lea.sflag [#allocation15], %s1152_s25 }
 0x449   : > { %1665 = dma.done.wait (%p1492_p5), %s1159_s22, 64  }
 0x44a   : > { %1667 = vsyncadd (%p1492_p5), %s1159_s22, 4294967232  ;;  %s1171_s16 = scalar_lea.sflag [#allocation20], %s1152_s25 }
 0x44b   : > { %1669 = dma.done.wait (%p1492_p5), %s1171_s16, 32  }
 0x44c   : > { %1671 = vsyncadd (%p1492_p5), %s1171_s16, 4294967264  ;;  %s2167_s13 = sld [smem:[#allocation37_spill]]  ;;  %p22_p6 = scmp.ge.s32.totalorder %s1769_s14, 10  }
 0x44d   : > { %s2168_s30 = smov %s1678_s10  ;;  %s2170_s11 = smov %s1769_s14 }
 0x44e   :  { %24 = sbr.rel (!%p22_p6) target bundleno = 10 (0xa), region = 374 }
 0x452   : > { %s2169_s10 = smov %s2167_s13 }
 0x455   :  { %1176 = vsyncpa [#allocation12], 1 }
 0x456   :  { %1178 = vsyncpa [#allocation12 + $0x1], 1 }
 0x457   :  { %1179 = vsyncpa [#allocation15], 1 }
 0x458   :  { %1181 = vsyncpa [#allocation15 + $0x1], 1 }
 0x459   :  { %1182 = vsyncpa [#allocation20], 1 }
 0x45a   :  { %1184 = vsyncpa [#allocation20 + $0x1], 1 }

// kernel: mmcr_loss.1
= control target key start
LH: loop header
LB: loop body
LE: loop exit
PB: predicated region body
PF: predicated region fallthrough
CT: control target
= control target key end

     0   :  { %9 = vsyncpa [#allocation3], 0  ;;  %s361_s0 = inlined_call_operand.hbm [shape: f32[8,64], index: 0, kind: input, shape index: {}]   ;;  %s362_s1 = inlined_call_operand.hbm [shape: f32[8,64], index: 1, kind: input, shape index: {}]   ;;  %s363_s2 = inlined_call_operand.hbm [shape: f32[8,32], index: 2, kind: output, shape index: {0}]   ;;  %s364_s3 = inlined_call_operand.hbm [shape: f32[8,128], index: 3, kind: output, shape index: {1}]  }
   0x1   :  { %10 = vsyncpa [#allocation6], 0 }
   0x2   :  { %11 = vsyncpa [#allocation4], 0 }
   0x3   :  { %12 = vsyncpa [#allocation9], 0  ;;  %s276_s12 = smov [#allocation2]   ;;  %s277_s14 = smov [#allocation5]  }
   0x4   :  { %s19_s13 = sshll.u32 %s276_s12, 4  ;;  %s29_s15 = sshll.u32 %s277_s14, 4  ;;  %s20_s13 = int_to_ptr.vmem [resolvable:$true] %s19_s13  ;;  %s30_s15 = int_to_ptr.vmem [resolvable:$true] %s29_s15 }
   0x5   :  { %s180_s18 = scalar_lea.hbm %s361_s0, 128 }
   0x6   :  { %p181_p0 = scmp.ne.s32.totalorder %s361_s0, %s180_s18  ;;  %p184_p1 = scmp.lt.u32.totalorder %s180_s18, %s361_s0 }
   0x8   :  { %p186_p2 = pnand %p184_p1, %p181_p0 }
   0xa   :  { %189 = shalt.err (!%p186_p2)
}
   0xb   :  { %s190_s23 = scalar_lea.vmem %s20_s13, 128  ;;  %p195_p4 = scmp.lt.s32.totalorder %s20_s13, %s20_s13 }
   0xc   :  { %p191_p3 = scmp.ne.s32.totalorder %s20_s13, %s190_s23  ;;  %p196_p5 = scmp.lt.s32.totalorder %s190_s23, %s190_s23 }
   0xe   :  { %p197_p6 = por %p196_p5, %p195_p4 }
  0x10   :  { %p198_p7 = pnand %p197_p6, %p191_p3 }
  0x12   :  { %201 = shalt.err (!%p198_p7)
}
  0x13   :  { %22 = dma.hbm_to_vmem [thread:$0]  %s361_s0, 128, %s20_s13, [#allocation3]  }
  0x14   :  { %s202_s28 = scalar_lea.hbm %s362_s1, 128 }
  0x15   :  { %p203_p8 = scmp.ne.s32.totalorder %s362_s1, %s202_s28  ;;  %p206_p9 = scmp.lt.u32.totalorder %s202_s28, %s362_s1 }
  0x17   :  { %p208_p10 = pnand %p206_p9, %p203_p8 }
  0x19   :  { %211 = shalt.err (!%p208_p10)
}
  0x1a   :  { %s212_s6 = scalar_lea.vmem %s30_s15, 128  ;;  %p217_p12 = scmp.lt.s32.totalorder %s30_s15, %s30_s15 }
  0x1b   :  { %p213_p11 = scmp.ne.s32.totalorder %s30_s15, %s212_s6  ;;  %p218_p13 = scmp.lt.s32.totalorder %s212_s6, %s212_s6 }
  0x1d   :  { %p219_p0 = por %p218_p13, %p217_p12 }
  0x1f   :  { %p220_p1 = pnand %p219_p0, %p213_p11 }
  0x21   :  { %223 = shalt.err (!%p220_p1)
}
  0x22   :  { %32 = dma.hbm_to_vmem [thread:$0]  %s362_s1, 128, %s30_s15, [#allocation6]  }
  0x23   :  { %268 = dma.done.wait [#allocation3], 128  }
  0x24   :  { %269 = vsyncadd [#allocation3], 4294967168 }
  0x25   :  { %270 = dma.done.wait [#allocation6], 128  }
  0x26   :  { %271 = vsyncadd [#allocation6], 4294967168  ;;  %v40_v0 = vld [vmem:[#allocation5] sm:$0xff]  ;;  %v39_v1 = vld [vmem:[#allocation2] sm:$0xff]  ;;  %s278_s8 = smov 32   ;;  %s279_s9 = smov 96  }
  0x27   :  { %78 = vrot.lane.b32.xlu0 %v40_v0, %s278_s8  ;;  %48 = vrot.lane.b32.xlu1 %v40_v0, %s279_s9  ;;  %v55_v2 = vmul.f32 %v39_v1, %v39_v1  ;;  %v63_v3 = vmul.f32 %v40_v0, %v39_v1  ;;  %vm53_vm0 = vcmask 261120   ;;  %v96_v9 = vmul.f32 %v40_v0, %v40_v0  ;;  %s280_s1 = smov [#allocation7]  }
  0x28   :  { %s150_s10 = sshll.u32 %s280_s1, 4  ;;  %s151_s10 = int_to_ptr.vmem [resolvable:$true] %s150_s10 }
  0x29   :  { %v56_v4 = vsel %vm53_vm0, %v55_v2, 0.0  ;;  %v64_v17 = vsel %vm53_vm0, %v63_v3, 0.0  ;;  %v97_v27 = vsel %vm53_vm0, %v96_v9, 0.0  ;;  %s224_s11 = scalar_lea.vmem %s151_s10, 128  ;;  %p229_p3 = scmp.lt.s32.totalorder %s151_s10, %s151_s10 }
  0x2a   :  { %p225_p2 = scmp.ne.s32.totalorder %s151_s10, %s224_s11  ;;  %p230_p4 = scmp.lt.s32.totalorder %s224_s11, %s224_s11 }
  0x2b   :  { %42 = vrot.lane.b32.xlu0 %v39_v1, %s279_s9  ;;  %72 = vrot.lane.b32.xlu1 %v55_v2, %s279_s9 }
  0x2c   :  { %p231_p5 = por %p230_p4, %p229_p3 }
  0x2e   :  { %p232_p6 = pnand %p231_p5, %p225_p2 }
  0x2f   :  { %90 = vrot.lane.b32.xlu1 %v63_v3, %s279_s9 }
  0x53   :  { %57 = vadd.xlane.f32.xlu1 %v56_v4 }
  0x99   :  { %v79_v5 = vpop.permute.xlu0 %78  ;;  %v49_v6 = vpop.permute.xlu1 %48 }
  0x9a   :  { %v81_v7 = vmul.f32 %v79_v5, %v39_v1  ;;  %v67_v8 = vmul.f32 %v49_v6, %v39_v1  ;;  %v100_v23 = vmul.f32 %v49_v6, %v40_v0 }
  0x9c   :  { %83 = vrot.lane.b32.xlu0 %v81_v7, %s279_s9  ;;  %v68_v10 = vsel %vm53_vm0, %v67_v8, 0.0  ;;  %v101_v24 = vsel %vm53_vm0, %v100_v23, 0.0 }
  0x9d   :  { %v43_v11 = vpop.permute.xlu0 %42  ;;  %69 = vadd.xlane.f32.xlu1 %v68_v10  ;;  %v73_v18 = vpop.permute.xlu1 %72 }
  0x9e   :  { %v45_v12 = vadd.f32 %v43_v11, %v39_v1  ;;  %v59_v16 = vmul.f32 %v43_v11, %v39_v1  ;;  %v75_v20 = vsel %vm53_vm0, %v73_v18, 0.0 }
  0xa0   :  { %105 = vrot.lane.b32.xlu0 %v96_v9, %s279_s9  ;;  %v46_v13 = vadd.f32 %v45_v12, %v40_v0  ;;  %v60_v19 = vsel %vm53_vm0, %v59_v16, 0.0 }
  0xa1   :  { %v91_v21 = vpop.permute.xlu1 %90 }
  0xa2   :  { %v51_v14 = vadd.f32 %v49_v6, %v46_v13  ;;  %v93_v22 = vsel %vm53_vm0, %v91_v21, 0.0 }
  0xa4   :  { %v52_v15 = vmul.f32 0.25, %v51_v14 }
  0xa6   :  { %54 = vst.msk [vmem:[#allocation7] sm:$0xff] %vm53_vm0, %v52_v15 }
  0xbf   :  { %65 = vadd.xlane.f32.xlu0 %v64_v17 }
  0xc3   :  { %61 = vadd.xlane.f32.xlu0 %v60_v19 }
  0xc7   :  { %76 = vadd.xlane.f32.xlu0 %v75_v20 }
  0xcb   :  { %94 = vadd.xlane.f32.xlu0 %v93_v22 }
  0xcf   :  { %102 = vadd.xlane.f32.xlu0 %v101_v24 }
 0x10e   :  { %v84_v25 = vpop.permute.xlu0 %83 }
 0x10f   :  { %v86_v26 = vsel %vm53_vm0, %v84_v25, 0.0 }
 0x110   :  { %87 = vadd.xlane.f32.xlu1 %v86_v26 }
 0x112   :  { %v106_v28 = vpop.permute.xlu0 %105 }
 0x113   :  { %v108_v29 = vsel %vm53_vm0, %v106_v28, 0.0 }
 0x114   :  { %98 = vadd.xlane.f32.xlu1 %v97_v27 }
 0x118   :  { %109 = vadd.xlane.f32.xlu1 %v108_v29 }
 0x119   :  { %235 = shalt.err (!%p232_p6)
}
 0x11a   :  { %s236_s14 = scalar_lea.hbm %s363_s2, 128 }
 0x11b   :  { %p237_p7 = scmp.ne.s32.totalorder %s363_s2, %s236_s14  ;;  %p240_p8 = scmp.lt.u32.totalorder %s236_s14, %s363_s2 }
 0x11d   :  { %p242_p9 = pnand %p240_p8, %p237_p7 }
 0x11f   :  { %245 = shalt.err (!%p242_p9)
}
 0x120   :  { %153 = dma.vmem_to_hbm [thread:$0]  %s151_s10, 128, %s363_s2, [#allocation4]   ;;  %vm111_vm1 = vcmask 7168   ;;  %v58_v31 = vpop.xlane.xlu1 %57  ;;  %vm113_vm2 = vcmask 15360   ;;  %vm115_vm3 = vcmask 23552   ;;  %vm117_vm4 = vcmask 31744  }
 0x121   :  { %vm119_vm5 = vcmask 39936   ;;  %vm121_vm6 = vcmask 48128   ;;  %vm123_vm7 = vcmask 56320   ;;  %vm125_vm8 = vcmask 64512   ;;  %s281_s2 = smov [#allocation8]  }
 0x122   :  { %vm127_vm9 = vcmask 72704   ;;  %vm129_vm10 = vcmask 80896   ;;  %vm131_vm11 = vcmask 89088   ;;  %vm133_vm12 = vcmask 97280   ;;  %s160_s21 = sshll.u32 %s281_s2, 4  ;;  %s161_s21 = int_to_ptr.vmem [resolvable:$true] %s160_s21 }
 0x123   :  { %vm135_vm13 = vcmask 105472   ;;  %vm137_vm14 = vcmask 113664   ;;  %vm139_vm15 = vcmask 121856   ;;  %vm141_vm0 = vcmask 130048   ;;  %s246_s22 = scalar_lea.vmem %s161_s21, 128  ;;  %p251_p11 = scmp.lt.s32.totalorder %s161_s21, %s161_s21 }
 0x124   :  { %p247_p10 = scmp.ne.s32.totalorder %s161_s21, %s246_s22  ;;  %p252_p12 = scmp.lt.s32.totalorder %s246_s22, %s246_s22 }
 0x126   :  { %p253_p13 = por %p252_p12, %p251_p11 }
 0x128   :  { %p254_p0 = pnand %p253_p13, %p247_p10 }
 0x12a   :  { %v70_v35 = vpop.xlane.xlu1 %69 }
 0x14c   :  { %v66_v30 = vpop.xlane.xlu0 %65 }
 0x150   :  { %v62_v32 = vpop.xlane.xlu0 %61 }
 0x151   :  { %v112_v33 = vsel %vm111_vm1, %v58_v31, %v62_v32 }
 0x152   :  { %v114_v34 = vsel %vm113_vm2, %v112_v33, %v66_v30 }
 0x153   :  { %v116_v37 = vsel %vm115_vm3, %v114_v34, %v70_v35 }
 0x154   :  { %v77_v36 = vpop.xlane.xlu0 %76  ;;  %v118_v38 = vsel %vm117_vm4, %v116_v37, %v62_v32 }
 0x155   :  { %v120_v40 = vsel %vm119_vm5, %v118_v38, %v77_v36 }
 0x158   :  { %v95_v39 = vpop.xlane.xlu0 %94 }
 0x15c   :  { %v103_v47 = vpop.xlane.xlu0 %102 }
 0x19d   :  { %v88_v41 = vpop.xlane.xlu1 %87 }
 0x19e   :  { %v122_v42 = vsel %vm121_vm6, %v120_v40, %v88_v41 }
 0x19f   :  { %v124_v43 = vsel %vm123_vm7, %v122_v42, %v95_v39 }
 0x1a0   :  { %v126_v44 = vsel %vm125_vm8, %v124_v43, %v66_v30 }
 0x1a1   :  { %v128_v45 = vsel %vm127_vm9, %v126_v44, %v88_v41  ;;  %v99_v46 = vpop.xlane.xlu1 %98 }
 0x1a2   :  { %v130_v48 = vsel %vm129_vm10, %v128_v45, %v99_v46 }
 0x1a3   :  { %v132_v49 = vsel %vm131_vm11, %v130_v48, %v103_v47 }
 0x1a4   :  { %v134_v50 = vsel %vm133_vm12, %v132_v49, %v70_v35 }
 0x1a5   :  { %v136_v51 = vsel %vm135_vm13, %v134_v50, %v95_v39  ;;  %v110_v52 = vpop.xlane.xlu1 %109 }
 0x1a6   :  { %v138_v53 = vsel %vm137_vm14, %v136_v51, %v103_v47 }
 0x1a7   :  { %v140_v54 = vsel %vm139_vm15, %v138_v53, %v110_v52 }
 0x1a8   :  { %v142_v55 = vsel %vm141_vm0, %v140_v54, 0.0 }
 0x1a9   :  { %143 = vst [vmem:[#allocation8] sm:$0xff] %v142_v55 }
 0x1aa   :  { %257 = shalt.err (!%p254_p0)
}
 0x1ab   :  { %s258_s25 = scalar_lea.hbm %s364_s3, 128 }
 0x1ac   :  { %p259_p1 = scmp.ne.s32.totalorder %s364_s3, %s258_s25  ;;  %p262_p2 = scmp.lt.u32.totalorder %s258_s25, %s364_s3 }
 0x1ae   :  { %p264_p3 = pnand %p262_p2, %p259_p1 }
 0x1b0   :  { %267 = shalt.err (!%p264_p3)
}
 0x1b1   :  { %163 = dma.vmem_to_hbm [thread:$0]  %s161_s21, 128, %s364_s3, [#allocation9]  }
 0x1b2   :  { %272 = dma.done.wait [#allocation4], 128  }
 0x1b3   :  { %273 = vsyncadd [#allocation4], 4294967168 }
 0x1b4   :  { %274 = dma.done.wait [#allocation9], 128  }
 0x1b5   :  { %275 = vsyncadd [#allocation9], 4294967168 }
 0x1b6   :  { %170 = vsyncpa [#allocation3], 1 }
 0x1b7   :  { %171 = vsyncpa [#allocation6], 1 }
 0x1b8   :  { %172 = vsyncpa [#allocation4], 1 }
 0x1b9   :  { %173 = vsyncpa [#allocation9], 1 }

</bundles_post_ra>
